<compile_context>
chip_gen: v5e
topology: v5e:2x2
jax: 0.10.0
libtpu: 0.0.40
codegen_flags: <defaults>
</compile_context>

<pallas_src>
import jax
import jax.numpy as jnp
from jax.experimental import pallas as pl
from jax.experimental.pallas import tpu as pltpu

EPS = 1e-3  # BatchNorm2d eps


def _fused_kernel(x_ref, w_ref, gamma_ref, beta_ref, o_ref):
    # x_ref:     (4, N, Hq, Wq*C)  zero-padded, parity-split, lane-folded input
    #            (parity index p = (kh%2)*2 + (kw%2))
    # w_ref:     (9, Wo*C)         depthwise weights, tiled along Wo
    # gamma_ref: (1, Wo*C), beta_ref: (1, Wo*C)   BN affine params, tiled
    # o_ref:     (N, Ho, Wo*C)
    _, N, Hq, WqC = x_ref.shape
    _, Ho, WoC = o_ref.shape
    C = WqC - WoC          # Wq*C - Wo*C = C
    Wo = WoC // C

    # depthwise 3x3 stride-2 conv as 9 shifted multiply-accumulates,
    # ReLU applied per patch (padding zeros unaffected by ReLU).
    acc = jnp.zeros((N, Ho, WoC), jnp.float32)
    for kh in range(3):
        for kw in range(3):
            p = (kh % 2) * 2 + (kw % 2)
            h0 = kh // 2
            c0 = (kw // 2) * C
            patch = x_ref[p, :, h0:h0 + Ho, c0:c0 + WoC]      # (N, Ho, Wo*C)
            patch = jnp.maximum(patch, 0.0)                    # relu1
            acc = acc + patch * w_ref[kh * 3 + kw, :]

    # ---- BatchNorm2d, training mode: batch stats, biased variance, one pass
    cnt = float(N * Ho * Wo)
    s1 = jnp.sum(acc, axis=(0, 1))[None, :]            # (1, Wo*C) per-(wo,c) sum
    s2 = jnp.sum(acc * acc, axis=(0, 1))[None, :]      # (1, Wo*C) per-(wo,c) sumsq

    # reduce across the Wo groups (period C on the lane axis) with cyclic
    # lane rolls; result is the per-channel total replicated at every wo slot.
    if Wo & (Wo - 1) == 0:                             # power of two: log steps
        shift = C
        while shift < WoC:
            s1 = s1 + pltpu.roll(s1, shift, axis=1)
            s2 = s2 + pltpu.roll(s2, shift, axis=1)
            shift *= 2
    else:                                              # general Wo: linear
        t1, t2 = s1, s2
        for k in range(1, Wo):
            t1 = t1 + pltpu.roll(s1, k * C, axis=1)
            t2 = t2 + pltpu.roll(s2, k * C, axis=1)
        s1, s2 = t1, t2

    inv_cnt = 1.0 / cnt
    mean_t = s1 * inv_cnt
    var_t = s2 * inv_cnt - mean_t * mean_t
    inv_t = jax.lax.rsqrt(var_t + EPS)
    scale_t = gamma_ref[...] * inv_t                   # (1, Wo*C)
    bias_t = beta_ref[...] - mean_t * scale_t

    o_ref[...] = jnp.maximum(acc * scale_t + bias_t, 0.0)   # relu2


def fused_relu_dwconv_bn_relu(x_nchw, w_oihw, gamma, beta):
    """x_nchw: (N, 64, H, W) f32; w_oihw: (64, 1, 3, 3); gamma/beta: (64,)."""
    N, C, H, W = x_nchw.shape
    assert H % 2 == 0 and W % 2 == 0
    Ho, Wo = H // 2, W // 2                            # k=3, s=2, p=1
    Hq, Wq = Ho + 1, Wo + 1

    # ---- layout plumbing (pad + parity split + lane fold, fused under jit)
    xp = jnp.pad(x_nchw, ((0, 0), (0, 0), (1, 1), (1, 1)))   # (N, C, 2Hq, 2Wq)
    xp = xp.reshape(N, C, Hq, 2, Wq, 2)
    xp = xp.transpose(3, 5, 0, 2, 4, 1)                      # (2, 2, N, Hq, Wq, C)
    x_par = xp.reshape(4, N, Hq, Wq * C)

    w_hwc = jnp.transpose(w_oihw[:, 0], (1, 2, 0)).reshape(9, C)     # (9, C)
    w_t = jnp.tile(w_hwc.astype(jnp.float32), (1, Wo))               # (9, Wo*C)
    gamma_t = jnp.tile(gamma.reshape(1, C).astype(jnp.float32), (1, Wo))
    beta_t = jnp.tile(beta.reshape(1, C).astype(jnp.float32), (1, Wo))

    flops = (2 * 9 + 12) * N * Ho * Wo * C
    bytes_accessed = 4 * (x_par.size + w_t.size + 2 * Wo * C + N * Ho * Wo * C)

    out = pl.pallas_call(
        _fused_kernel,
        out_shape=jax.ShapeDtypeStruct((N, Ho, Wo * C), jnp.float32),
        grid=(1,),
        in_specs=[
            pl.BlockSpec((4, N, Hq, Wq * C), lambda i: (0, 0, 0, 0)),
            pl.BlockSpec((9, Wo * C), lambda i: (0, 0)),
            pl.BlockSpec((1, Wo * C), lambda i: (0, 0)),
            pl.BlockSpec((1, Wo * C), lambda i: (0, 0)),
        ],
        out_specs=pl.BlockSpec((N, Ho, Wo * C), lambda i: (0, 0, 0)),
        compiler_params=pltpu.CompilerParams(
            dimension_semantics=("arbitrary",)),
        cost_estimate=pl.CostEstimate(
            flops=flops, transcendentals=Wo * C, bytes_accessed=bytes_accessed),
    )(x_par, w_t, gamma_t, beta_t)

    # back to NCHW
    return out.reshape(N, Ho, Wo, C).transpose(0, 3, 1, 2)


def _reference(x_nchw, w_oihw, gamma, beta):
    """Pure-JAX reference of the PyTorch forward pass (training-mode BN)."""
    xr = jnp.maximum(x_nchw, 0.0)
    conv = jax.lax.conv_general_dilated(
        xr, w_oihw, window_strides=(2, 2), padding=((1, 1), (1, 1)),
        feature_group_count=x_nchw.shape[1],
        dimension_numbers=("NCHW", "OIHW", "NCHW"))
    mean = conv.mean(axis=(0, 2, 3), keepdims=True)
    var = conv.var(axis=(0, 2, 3), keepdims=True)           # biased variance
    y = (conv - mean) / jnp.sqrt(var + EPS)
    y = y * gamma.reshape(1, -1, 1, 1) + beta.reshape(1, -1, 1, 1)
    return jnp.maximum(y, 0.0)


if __name__ == "__main__":
    key = jax.random.PRNGKey(0)
    k_x, k_w, k_g, k_b = jax.random.split(key, 4)

    # Channels must stay 64 (depthwise conv, groups=64); small batch/spatial.
    N, C, H, W = 2, 64, 16, 16
    x = jax.random.normal(k_x, (N, C, H, W), dtype=jnp.float32)

    w = 0.1 * jax.random.normal(k_w, (C, 1, 3, 3), dtype=jnp.float32)    # Conv2d weight
    gamma = 1.0 + 0.1 * jax.random.normal(k_g, (C,), dtype=jnp.float32)  # BN weight
    beta = 0.1 * jax.random.normal(k_b, (C,), dtype=jnp.float32)         # BN bias

    fn = jax.jit(fused_relu_dwconv_bn_relu)
    out = jax.block_until_ready(fn(x, w, gamma, beta))

    ref = _reference(x, w, gamma, beta)
    assert out.shape == (N, C, H // 2, W // 2), out.shape
    assert jnp.allclose(out, ref, atol=1e-4, rtol=1e-4), (
        float(jnp.max(jnp.abs(out - ref))))

    print("KERNEL_OK")
</pallas_src>

<mosaic_0001>
module attributes {stable_mosaic.version = 11 : i64} {
  func.func @_fused_kernel(%arg0: i32, %arg1: memref<4x2x9x576xf32, #tpu.memory_space<vmem>>, %arg2: memref<9x512xf32, #tpu.memory_space<vmem>>, %arg3: memref<1x512xf32, #tpu.memory_space<vmem>>, %arg4: memref<1x512xf32, #tpu.memory_space<vmem>>, %arg5: memref<2x8x512xf32, #tpu.memory_space<vmem>>) attributes {dimension_semantics = [#tpu.dimension_semantics<arbitrary>], iteration_bounds = array<i64: 1>, scalar_prefetch = 0 : i64, scratch_operands = 0 : i64, tpu.core_type = #tpu.core_type<tc>, window_params = [{pipeline_mode = #tpu.pipeline_mode<synchronous>, transform_indices = @transform_0, window_bounds = array<i64: 4, 2, 9, 576>}, {pipeline_mode = #tpu.pipeline_mode<synchronous>, transform_indices = @transform_1, window_bounds = array<i64: 9, 512>}, {pipeline_mode = #tpu.pipeline_mode<synchronous>, transform_indices = @transform_2, window_bounds = array<i64: 1, 512>}, {pipeline_mode = #tpu.pipeline_mode<synchronous>, transform_indices = @transform_3, window_bounds = array<i64: 1, 512>}, {pipeline_mode = #tpu.pipeline_mode<synchronous>, transform_indices = @transform_4, window_bounds = array<i64: 2, 8, 512>}]} {
    %cst = arith.constant 0.000000e+00 : f32
    %0 = vector.broadcast %cst : f32 to vector<2x8x512xf32>
    %c0 = arith.constant 0 : index
    %c0_0 = arith.constant 0 : index
    %c0_1 = arith.constant 0 : index
    %c0_2 = arith.constant 0 : index
    %1 = vector.load %arg1[%c0, %c0_0, %c0_1, %c0_2] : memref<4x2x9x576xf32, #tpu.memory_space<vmem>>, vector<1x2x8x512xf32>
    %2 = vector.shape_cast %1 : vector<1x2x8x512xf32> to vector<2x8x512xf32>
    %cst_3 = arith.constant 0.000000e+00 : f32
    %3 = vector.broadcast %cst_3 : f32 to vector<2x8x512xf32>
    %4 = arith.maximumf %2, %3 : vector<2x8x512xf32>
    %c0_4 = arith.constant 0 : index
    %c0_5 = arith.constant 0 : index
    %5 = vector.load %arg2[%c0_4, %c0_5] : memref<9x512xf32, #tpu.memory_space<vmem>>, vector<1x512xf32>
    %6 = vector.shape_cast %5 : vector<1x512xf32> to vector<512xf32>
    %7 = vector.shape_cast %6 : vector<512xf32> to vector<1x1x512xf32>
    %8 = vector.broadcast %7 : vector<1x1x512xf32> to vector<2x8x512xf32>
    %9 = arith.mulf %4, %8 : vector<2x8x512xf32>
    %10 = arith.addf %0, %9 : vector<2x8x512xf32>
    %c1 = arith.constant 1 : index
    %c0_6 = arith.constant 0 : index
    %c0_7 = arith.constant 0 : index
    %c0_8 = arith.constant 0 : index
    %11 = vector.load %arg1[%c1, %c0_6, %c0_7, %c0_8] : memref<4x2x9x576xf32, #tpu.memory_space<vmem>>, vector<1x2x8x512xf32>
    %12 = vector.shape_cast %11 : vector<1x2x8x512xf32> to vector<2x8x512xf32>
    %cst_9 = arith.constant 0.000000e+00 : f32
    %13 = vector.broadcast %cst_9 : f32 to vector<2x8x512xf32>
    %14 = arith.maximumf %12, %13 : vector<2x8x512xf32>
    %c1_10 = arith.constant 1 : index
    %c0_11 = arith.constant 0 : index
    %15 = vector.load %arg2[%c1_10, %c0_11] : memref<9x512xf32, #tpu.memory_space<vmem>>, vector<1x512xf32>
    %16 = vector.shape_cast %15 : vector<1x512xf32> to vector<512xf32>
    %17 = vector.shape_cast %16 : vector<512xf32> to vector<1x1x512xf32>
    %18 = vector.broadcast %17 : vector<1x1x512xf32> to vector<2x8x512xf32>
    %19 = arith.mulf %14, %18 : vector<2x8x512xf32>
    %20 = arith.addf %10, %19 : vector<2x8x512xf32>
    %c0_12 = arith.constant 0 : index
    %c0_13 = arith.constant 0 : index
    %c0_14 = arith.constant 0 : index
    %c64 = arith.constant 64 : index
    %21 = vector.load %arg1[%c0_12, %c0_13, %c0_14, %c64] : memref<4x2x9x576xf32, #tpu.memory_space<vmem>>, vector<1x2x8x512xf32>
    %22 = vector.shape_cast %21 : vector<1x2x8x512xf32> to vector<2x8x512xf32>
    %cst_15 = arith.constant 0.000000e+00 : f32
    %23 = vector.broadcast %cst_15 : f32 to vector<2x8x512xf32>
    %24 = arith.maximumf %22, %23 : vector<2x8x512xf32>
    %c2 = arith.constant 2 : index
    %c0_16 = arith.constant 0 : index
    %25 = vector.load %arg2[%c2, %c0_16] : memref<9x512xf32, #tpu.memory_space<vmem>>, vector<1x512xf32>
    %26 = vector.shape_cast %25 : vector<1x512xf32> to vector<512xf32>
    %27 = vector.shape_cast %26 : vector<512xf32> to vector<1x1x512xf32>
    %28 = vector.broadcast %27 : vector<1x1x512xf32> to vector<2x8x512xf32>
    %29 = arith.mulf %24, %28 : vector<2x8x512xf32>
    %30 = arith.addf %20, %29 : vector<2x8x512xf32>
    %c2_17 = arith.constant 2 : index
    %c0_18 = arith.constant 0 : index
    %c0_19 = arith.constant 0 : index
    %c0_20 = arith.constant 0 : index
    %31 = vector.load %arg1[%c2_17, %c0_18, %c0_19, %c0_20] : memref<4x2x9x576xf32, #tpu.memory_space<vmem>>, vector<1x2x8x512xf32>
    %32 = vector.shape_cast %31 : vector<1x2x8x512xf32> to vector<2x8x512xf32>
    %cst_21 = arith.constant 0.000000e+00 : f32
    %33 = vector.broadcast %cst_21 : f32 to vector<2x8x512xf32>
    %34 = arith.maximumf %32, %33 : vector<2x8x512xf32>
    %c3 = arith.constant 3 : index
    %c0_22 = arith.constant 0 : index
    %35 = vector.load %arg2[%c3, %c0_22] : memref<9x512xf32, #tpu.memory_space<vmem>>, vector<1x512xf32>
    %36 = vector.shape_cast %35 : vector<1x512xf32> to vector<512xf32>
    %37 = vector.shape_cast %36 : vector<512xf32> to vector<1x1x512xf32>
    %38 = vector.broadcast %37 : vector<1x1x512xf32> to vector<2x8x512xf32>
    %39 = arith.mulf %34, %38 : vector<2x8x512xf32>
    %40 = arith.addf %30, %39 : vector<2x8x512xf32>
    %c3_23 = arith.constant 3 : index
    %c0_24 = arith.constant 0 : index
    %c0_25 = arith.constant 0 : index
    %c0_26 = arith.constant 0 : index
    %41 = vector.load %arg1[%c3_23, %c0_24, %c0_25, %c0_26] : memref<4x2x9x576xf32, #tpu.memory_space<vmem>>, vector<1x2x8x512xf32>
    %42 = vector.shape_cast %41 : vector<1x2x8x512xf32> to vector<2x8x512xf32>
    %cst_27 = arith.constant 0.000000e+00 : f32
    %43 = vector.broadcast %cst_27 : f32 to vector<2x8x512xf32>
    %44 = arith.maximumf %42, %43 : vector<2x8x512xf32>
    %c4 = arith.constant 4 : index
    %c0_28 = arith.constant 0 : index
    %45 = vector.load %arg2[%c4, %c0_28] : memref<9x512xf32, #tpu.memory_space<vmem>>, vector<1x512xf32>
    %46 = vector.shape_cast %45 : vector<1x512xf32> to vector<512xf32>
    %47 = vector.shape_cast %46 : vector<512xf32> to vector<1x1x512xf32>
    %48 = vector.broadcast %47 : vector<1x1x512xf32> to vector<2x8x512xf32>
    %49 = arith.mulf %44, %48 : vector<2x8x512xf32>
    %50 = arith.addf %40, %49 : vector<2x8x512xf32>
    %c2_29 = arith.constant 2 : index
    %c0_30 = arith.constant 0 : index
    %c0_31 = arith.constant 0 : index
    %c64_32 = arith.constant 64 : index
    %51 = vector.load %arg1[%c2_29, %c0_30, %c0_31, %c64_32] : memref<4x2x9x576xf32, #tpu.memory_space<vmem>>, vector<1x2x8x512xf32>
    %52 = vector.shape_cast %51 : vector<1x2x8x512xf32> to vector<2x8x512xf32>
    %cst_33 = arith.constant 0.000000e+00 : f32
    %53 = vector.broadcast %cst_33 : f32 to vector<2x8x512xf32>
    %54 = arith.maximumf %52, %53 : vector<2x8x512xf32>
    %c5 = arith.constant 5 : index
    %c0_34 = arith.constant 0 : index
    %55 = vector.load %arg2[%c5, %c0_34] : memref<9x512xf32, #tpu.memory_space<vmem>>, vector<1x512xf32>
    %56 = vector.shape_cast %55 : vector<1x512xf32> to vector<512xf32>
    %57 = vector.shape_cast %56 : vector<512xf32> to vector<1x1x512xf32>
    %58 = vector.broadcast %57 : vector<1x1x512xf32> to vector<2x8x512xf32>
    %59 = arith.mulf %54, %58 : vector<2x8x512xf32>
    %60 = arith.addf %50, %59 : vector<2x8x512xf32>
    %c0_35 = arith.constant 0 : index
    %c0_36 = arith.constant 0 : index
    %c1_37 = arith.constant 1 : index
    %c0_38 = arith.constant 0 : index
    %61 = vector.load %arg1[%c0_35, %c0_36, %c1_37, %c0_38] : memref<4x2x9x576xf32, #tpu.memory_space<vmem>>, vector<1x2x8x512xf32>
    %62 = vector.shape_cast %61 : vector<1x2x8x512xf32> to vector<2x8x512xf32>
    %cst_39 = arith.constant 0.000000e+00 : f32
    %63 = vector.broadcast %cst_39 : f32 to vector<2x8x512xf32>
    %64 = arith.maximumf %62, %63 : vector<2x8x512xf32>
    %c6 = arith.constant 6 : index
    %c0_40 = arith.constant 0 : index
    %65 = vector.load %arg2[%c6, %c0_40] : memref<9x512xf32, #tpu.memory_space<vmem>>, vector<1x512xf32>
    %66 = vector.shape_cast %65 : vector<1x512xf32> to vector<512xf32>
    %67 = vector.shape_cast %66 : vector<512xf32> to vector<1x1x512xf32>
    %68 = vector.broadcast %67 : vector<1x1x512xf32> to vector<2x8x512xf32>
    %69 = arith.mulf %64, %68 : vector<2x8x512xf32>
    %70 = arith.addf %60, %69 : vector<2x8x512xf32>
    %c1_41 = arith.constant 1 : index
    %c0_42 = arith.constant 0 : index
    %c1_43 = arith.constant 1 : index
    %c0_44 = arith.constant 0 : index
    %71 = vector.load %arg1[%c1_41, %c0_42, %c1_43, %c0_44] : memref<4x2x9x576xf32, #tpu.memory_space<vmem>>, vector<1x2x8x512xf32>
    %72 = vector.shape_cast %71 : vector<1x2x8x512xf32> to vector<2x8x512xf32>
    %cst_45 = arith.constant 0.000000e+00 : f32
    %73 = vector.broadcast %cst_45 : f32 to vector<2x8x512xf32>
    %74 = arith.maximumf %72, %73 : vector<2x8x512xf32>
    %c7 = arith.constant 7 : index
    %c0_46 = arith.constant 0 : index
    %75 = vector.load %arg2[%c7, %c0_46] : memref<9x512xf32, #tpu.memory_space<vmem>>, vector<1x512xf32>
    %76 = vector.shape_cast %75 : vector<1x512xf32> to vector<512xf32>
    %77 = vector.shape_cast %76 : vector<512xf32> to vector<1x1x512xf32>
    %78 = vector.broadcast %77 : vector<1x1x512xf32> to vector<2x8x512xf32>
    %79 = arith.mulf %74, %78 : vector<2x8x512xf32>
    %80 = arith.addf %70, %79 : vector<2x8x512xf32>
    %c0_47 = arith.constant 0 : index
    %c0_48 = arith.constant 0 : index
    %c1_49 = arith.constant 1 : index
    %c64_50 = arith.constant 64 : index
    %81 = vector.load %arg1[%c0_47, %c0_48, %c1_49, %c64_50] : memref<4x2x9x576xf32, #tpu.memory_space<vmem>>, vector<1x2x8x512xf32>
    %82 = vector.shape_cast %81 : vector<1x2x8x512xf32> to vector<2x8x512xf32>
    %cst_51 = arith.constant 0.000000e+00 : f32
    %83 = vector.broadcast %cst_51 : f32 to vector<2x8x512xf32>
    %84 = arith.maximumf %82, %83 : vector<2x8x512xf32>
    %c8 = arith.constant 8 : index
    %c0_52 = arith.constant 0 : index
    %85 = vector.load %arg2[%c8, %c0_52] : memref<9x512xf32, #tpu.memory_space<vmem>>, vector<1x512xf32>
    %86 = vector.shape_cast %85 : vector<1x512xf32> to vector<512xf32>
    %87 = vector.shape_cast %86 : vector<512xf32> to vector<1x1x512xf32>
    %88 = vector.broadcast %87 : vector<1x1x512xf32> to vector<2x8x512xf32>
    %89 = arith.mulf %84, %88 : vector<2x8x512xf32>
    %90 = arith.addf %80, %89 : vector<2x8x512xf32>
    %cst_53 = arith.constant dense<0.000000e+00> : vector<512xf32>
    %91 = vector.multi_reduction <add>, %90, %cst_53 [0, 1] : vector<2x8x512xf32> to vector<512xf32>
    %92 = vector.shape_cast %91 : vector<512xf32> to vector<1x512xf32>
    %93 = arith.mulf %90, %90 : vector<2x8x512xf32>
    %cst_54 = arith.constant dense<0.000000e+00> : vector<512xf32>
    %94 = vector.multi_reduction <add>, %93, %cst_54 [0, 1] : vector<2x8x512xf32> to vector<512xf32>
    %95 = vector.shape_cast %94 : vector<512xf32> to vector<1x512xf32>
    %c64_i32 = arith.constant 64 : i32
    %96 = tpu.dynamic_rotate %92 by %c64_i32 dim 1 : vector<1x512xf32>, i32 -> vector<1x512xf32>
    %97 = arith.addf %92, %96 : vector<1x512xf32>
    %c64_i32_55 = arith.constant 64 : i32
    %98 = tpu.dynamic_rotate %95 by %c64_i32_55 dim 1 : vector<1x512xf32>, i32 -> vector<1x512xf32>
    %99 = arith.addf %95, %98 : vector<1x512xf32>
    %c128_i32 = arith.constant 128 : i32
    %100 = tpu.dynamic_rotate %97 by %c128_i32 dim 1 : vector<1x512xf32>, i32 -> vector<1x512xf32>
    %101 = arith.addf %97, %100 : vector<1x512xf32>
    %c128_i32_56 = arith.constant 128 : i32
    %102 = tpu.dynamic_rotate %99 by %c128_i32_56 dim 1 : vector<1x512xf32>, i32 -> vector<1x512xf32>
    %103 = arith.addf %99, %102 : vector<1x512xf32>
    %c256_i32 = arith.constant 256 : i32
    %104 = tpu.dynamic_rotate %101 by %c256_i32 dim 1 : vector<1x512xf32>, i32 -> vector<1x512xf32>
    %105 = arith.addf %101, %104 : vector<1x512xf32>
    %c256_i32_57 = arith.constant 256 : i32
    %106 = tpu.dynamic_rotate %103 by %c256_i32_57 dim 1 : vector<1x512xf32>, i32 -> vector<1x512xf32>
    %107 = arith.addf %103, %106 : vector<1x512xf32>
    %cst_58 = arith.constant 7.812500e-03 : f32
    %108 = vector.broadcast %cst_58 : f32 to vector<1x512xf32>
    %109 = arith.mulf %105, %108 : vector<1x512xf32>
    %cst_59 = arith.constant 7.812500e-03 : f32
    %110 = vector.broadcast %cst_59 : f32 to vector<1x512xf32>
    %111 = arith.mulf %107, %110 : vector<1x512xf32>
    %112 = arith.mulf %109, %109 : vector<1x512xf32>
    %113 = arith.subf %111, %112 : vector<1x512xf32>
    %cst_60 = arith.constant 1.000000e-03 : f32
    %114 = vector.broadcast %cst_60 : f32 to vector<1x512xf32>
    %115 = arith.addf %113, %114 : vector<1x512xf32>
    %116 = math.rsqrt %115 : vector<1x512xf32>
    %c0_61 = arith.constant 0 : index
    %c0_62 = arith.constant 0 : index
    %117 = vector.load %arg3[%c0_61, %c0_62] : memref<1x512xf32, #tpu.memory_space<vmem>>, vector<1x512xf32>
    %118 = arith.mulf %117, %116 : vector<1x512xf32>
    %c0_63 = arith.constant 0 : index
    %c0_64 = arith.constant 0 : index
    %119 = vector.load %arg4[%c0_63, %c0_64] : memref<1x512xf32, #tpu.memory_space<vmem>>, vector<1x512xf32>
    %120 = arith.mulf %109, %118 : vector<1x512xf32>
    %121 = arith.subf %119, %120 : vector<1x512xf32>
    %122 = vector.shape_cast %118 : vector<1x512xf32> to vector<1x1x512xf32>
    %123 = vector.broadcast %122 : vector<1x1x512xf32> to vector<2x8x512xf32>
    %124 = arith.mulf %90, %123 : vector<2x8x512xf32>
    %125 = vector.shape_cast %121 : vector<1x512xf32> to vector<1x1x512xf32>
    %126 = vector.broadcast %125 : vector<1x1x512xf32> to vector<2x8x512xf32>
    %127 = arith.addf %124, %126 : vector<2x8x512xf32>
    %cst_65 = arith.constant 0.000000e+00 : f32
    %128 = vector.broadcast %cst_65 : f32 to vector<2x8x512xf32>
    %129 = arith.maximumf %127, %128 : vector<2x8x512xf32>
    %c0_66 = arith.constant 0 : index
    %c0_67 = arith.constant 0 : index
    %c0_68 = arith.constant 0 : index
    %130 = vector.load %arg5[%c0_66, %c0_67, %c0_68] : memref<2x8x512xf32, #tpu.memory_space<vmem>>, vector<2x8x512xf32>
    tpu.vector_store %arg5[%c0_66, %c0_67, %c0_68], %129 {strides = array<i32>} : memref<2x8x512xf32, #tpu.memory_space<vmem>>, vector<2x8x512xf32>,
    return
  }
  func.func @transform_0(%arg0: i32) -> (i32, i32, i32, i32) {
    %c0_i32 = arith.constant 0 : i32
    %c0_i32_0 = arith.constant 0 : i32
    %c0_i32_1 = arith.constant 0 : i32
    %c0_i32_2 = arith.constant 0 : i32
    %c0_i32_3 = arith.constant 0 : i32
    return %c0_i32, %c0_i32_0, %c0_i32_1, %c0_i32_2 : i32, i32, i32, i32
  }
  func.func @transform_1(%arg0: i32) -> (i32, i32) {
    %c0_i32 = arith.constant 0 : i32
    %c0_i32_0 = arith.constant 0 : i32
    %c0_i32_1 = arith.constant 0 : i32
    return %c0_i32, %c0_i32_0 : i32, i32
  }
  func.func @transform_2(%arg0: i32) -> (i32, i32) {
    %c0_i32 = arith.constant 0 : i32
    %c0_i32_0 = arith.constant 0 : i32
    %c0_i32_1 = arith.constant 0 : i32
    return %c0_i32, %c0_i32_0 : i32, i32
  }
  func.func @transform_3(%arg0: i32) -> (i32, i32) {
    %c0_i32 = arith.constant 0 : i32
    %c0_i32_0 = arith.constant 0 : i32
    %c0_i32_1 = arith.constant 0 : i32
    return %c0_i32, %c0_i32_0 : i32, i32
  }
  func.func @transform_4(%arg0: i32) -> (i32, i32, i32) {
    %c0_i32 = arith.constant 0 : i32
    %c0_i32_0 = arith.constant 0 : i32
    %c0_i32_1 = arith.constant 0 : i32
    %c0_i32_2 = arith.constant 0 : i32
    return %c0_i32, %c0_i32_0, %c0_i32_1 : i32, i32, i32
  }
}

</mosaic_0001>

<bundles_post_ra>
// kernel: tile.15
= control target key start
LH: loop header
LB: loop body
LE: loop exit
PB: predicated region body
PF: predicated region fallthrough
CT: control target
= control target key end

     0   :  { %vm48_vm0 = vcmask 1045506   ;;  %vm53_vm1 = vcmask 1047558   ;;  %s63_s6 = smov 3  ;;  %vm37_vm2 = vcmask 1047556   ;;  %vm87_vm3 = vcmask 1043458   ;;  %s70_s11 = smov 192  ;;  %s276_s0 = inlined_call_operand.vmem [shape: f32[9,8,64], index: 0, kind: input, shape index: {}]   ;;  %s277_s1 = inlined_call_operand.vmem [shape: f32[9,512], index: 1, kind: output, shape index: {}]  }
   0x1   :  { %v134_v0 = vld [vmem:[%s276_s0 + $0x43] ss:$-8 sm:%s63_s6]   ;;  %v135_v1 = vld [vmem:[%s276_s0 - $0xb] ss:$8 sm:$0x3c]   ;;  %s82_s16 = smov 3 }
   0x2   :  { %v68_v2 = vsel %vm48_vm0, %v135_v1, %v134_v0  ;;  %v136_v3 = vld [vmem:[%s276_s0 - $0xb] ss:$8 sm:%s70_s11]   ;;  %v127_v4 = vld [vmem:[%s276_s0 + $0x1] ss:$8 sm:$0xf]   ;;  %s85_s21 = smov 12 }
   0x3   :  { %v73_v5 = vsel %vm53_vm1, %v136_v3, %v68_v2  ;;  %v128_v6 = vld [vmem:[%s276_s0 + $0x1] ss:$8 sm:$0xf0]   ;;  %v139_v7 = vld [vmem:[%s276_s0 + $0x45] ss:$-16 sm:%s82_s16]   ;;  %s149_s22 = smov 64  }
   0x4   :  { %74 = vrot.lane.b32.xlu1 %v73_v5, %s149_s22  ;;  %v38_v8 = vsel %vm37_vm2, %v128_v6, %v127_v4  ;;  %v140_v9 = vld [vmem:[%s276_s0 + $0xa9] ss:$-54 sm:%s85_s21]   ;;  %s44_s27 = smov 3  ;;  %s51_s3 = smov 192  ;;  %vm3_vm4 = vcmask 523264   ;;  %vm41_vm5 = vcmask 1048064  }
   0x5   :  { %v141_v10 = vld [vmem:[%s276_s0 - $0x11] ss:$8 sm:$0xf0]   ;;  %39 = vrot.lane.b32.xlu0 %v38_v8, %s149_s22  ;;  %v130_v12 = vld [vmem:[%s276_s0 - $0x5] ss:$8 sm:$0x3c]   ;;  %v88_v13 = vsel %vm87_vm3, %v140_v9, %v139_v7 }
   0x6   :  { %v129_v11 = vld [vmem:[%s276_s0 + $0x41] ss:$-62 sm:%s44_s27]   ;;  %s101_s6 = smov 3  ;;  %s104_s7 = smov 12  ;;  %v92_v19 = vsel %vm37_vm2, %v141_v10, %v88_v13  ;;  %v2_v21 = vld [vmem:[%s276_s0] ss:$2 sm:$0xff]  }
   0x7   :  { %v131_v14 = vld [vmem:[%s276_s0 - $0x5] ss:$8 sm:%s51_s3]   ;;  %v49_v15 = vsel %vm48_vm0, %v130_v12, %v129_v11  ;;  %v144_v16 = vld [vmem:[%s276_s0 + $0x47] ss:$-24 sm:%s101_s6]  }
   0x8   :  { %v145_v17 = vld [vmem:[%s276_s0 + $0x27] ss:$8 sm:%s104_s7]   ;;  %v54_v20 = vsel %vm53_vm1, %v131_v14, %v49_v15  ;;  %v116_v22 = vld [vmem:[%s276_s0 + $0x10] ss:$2 sm:$0xff]   ;;  %v119_v23 = vld [vmem:[%s276_s0 + $0x20] ss:$2 sm:$0xff]  }
   0x9   :  { %v107_v18 = vsel %vm87_vm3, %v145_v17, %v144_v16  ;;  %4 = vst.msk [vmem:[%s277_s1] ss:$8 sm:$0xf] %vm3_vm4, %v2_v21   ;;  %v122_v24 = vld [vmem:[%s276_s0 + $0x30] ss:$2 sm:$0xff]  }
   0xa   :  { %108 = vrot.lane.b32.xlu2 %v107_v18, %s149_s22  ;;  %115 = vst.msk [vmem:[%s277_s1 - $0x1f] ss:$8 sm:$0xf0] %vm3_vm4, %v2_v21   ;;  %v125_v25 = vld [vmem:[%s276_s0 + $0x40] ss:$2 sm:$0xf]  }
   0xb   :  { %117 = vst.msk [vmem:[%s277_s1 + $0x2] ss:$8 sm:$0xf] %vm3_vm4, %v116_v22  }
   0xc   :  { %93 = vrot.lane.b32.xlu1 %v92_v19, %s149_s22  ;;  %118 = vst.msk [vmem:[%s277_s1 - $0x1d] ss:$8 sm:$0xf0] %vm3_vm4, %v116_v22  }
   0xd   :  { %55 = vrot.lane.b32.xlu0 %v54_v20, %s149_s22  ;;  %120 = vst.msk [vmem:[%s277_s1 + $0x4] ss:$8 sm:$0xf] %vm3_vm4, %v119_v23  }
   0xe   :  { %121 = vst.msk [vmem:[%s277_s1 - $0x1b] ss:$8 sm:$0xf0] %vm3_vm4, %v119_v23  }
   0xf   :  { %124 = vst.msk [vmem:[%s277_s1 - $0x19] ss:$8 sm:$0xf0] %vm3_vm4, %v122_v24  }
  0x10   :  { %126 = vst.msk [vmem:[%s277_s1 + $0x20] ss:$8 sm:$0xf] %vm3_vm4, %v125_v25  }
  0x11   :  { %123 = vst.msk [vmem:[%s277_s1 + $0x6] ss:$8 sm:$0xf] %vm3_vm4, %v122_v24  }
  0x64   :  { %v109_v26 = vpop.permute.xlu2 %108  }
  0x65   :  { %146 = vst.msk [vmem:[%s277_s1 + $0x38] ss:$-27 sm:$0x3] %vm41_vm5, %v109_v26  }
  0x66   :  { %147 = vst.msk [vmem:[%s277_s1 + $0x1c] sm:$0xc] %vm41_vm5, %v109_v26  }
  0x76   :  { %v75_v27 = vpop.permute.xlu1 %74  }
  0x77   :  { %137 = vst.msk [vmem:[%s277_s1 + $0x28] ss:$-25 sm:$0x3] %vm41_vm5, %v75_v27   ;;  %v40_v28 = vpop.permute.xlu0 %39  }
  0x78   :  { %138 = vst.msk [vmem:[%s277_s1 + $0xe] sm:$0xfc] %vm41_vm5, %v75_v27  }
  0x79   :  { %42 = vst.msk [vmem:[%s277_s1] sm:$0xff] %vm41_vm5, %v40_v28  }
  0x7e   :  { %v94_v29 = vpop.permute.xlu1 %93  }
  0x7f   :  { %142 = vst.msk [vmem:[%s277_s1 + $0x30] ss:$-26 sm:$0x3] %vm41_vm5, %v94_v29   ;;  %v56_v30 = vpop.permute.xlu0 %55  }
  0x80   :  { %143 = vst.msk [vmem:[%s277_s1 + $0x15] sm:$0xfc] %vm41_vm5, %v94_v29  }
  0x81   :  { %132 = vst.msk [vmem:[%s277_s1 + $0x20] ss:$-24 sm:$0x3] %vm41_vm5, %v56_v30  }
  0x82   :  { %133 = vst.msk [vmem:[%s277_s1 + $0x7] sm:$0xfc] %vm41_vm5, %v56_v30  }

// kernel: fused_relu_dwconv_bn_relu.1
= control target key start
LH: loop header
LB: loop body
LE: loop exit
PB: predicated region body
PF: predicated region fallthrough
CT: control target
= control target key end

     0   :  { %s1031_s19 = smov 64   ;;  %vm122_vm0 = vcmask 523264   ;;  %vm449_vm1 = vcmask 1046528   ;;  %vm897_vm9 = vcmask 1040384   ;;  %vm899_vm10 = vcmask 1042434   ;;  %s2004_s1 = inlined_call_operand.vmem [shape: f32[9,512], index: 1, kind: input, shape index: {}]   ;;  %s2005_s0 = inlined_call_operand.vmem [shape: f32[4,2,9,576], index: 0, kind: input, shape index: {}]   ;;  %s2006_s2 = inlined_call_operand.vmem [shape: f32[1,512], index: 2, kind: input, shape index: {}]   ;;  %s2007_s3 = inlined_call_operand.vmem [shape: f32[1,512], index: 3, kind: input, shape index: {}]   ;;  %s2008_s4 = inlined_call_operand.vmem [shape: f32[2,8,512], index: 4, kind: output, shape index: {}]  }
   0x1   :  { %v985_v0 = vld [vmem:[%s2004_s1 + $0x2] ss:$8 sm:$0xf]  ;;  %v1006_v3 = vld [vmem:[%s2004_s1 + $0x5] ss:$8 sm:$0xf] }
   0x2   :  { %v112_v1 = vperm.slane %v985_v0, 2  ;;  %v110_v2 = vperm.slane %v985_v0, 0  ;;  %v290_v4 = vperm.slane %v1006_v3, 0  ;;  %v113_v5 = vperm.slane %v985_v0, 3  ;;  %v1081_v15 = vld [vmem:[%s2005_s0] sm:$0xff]  ;;  %v1086_v16 = vld [vmem:[%s2005_s0 + $0x50] sm:$0xff] }
   0x3   :  { %v111_v6 = vperm.slane %v985_v0, 1  ;;  %v291_v7 = vperm.slane %v1006_v3, 1  ;;  %v293_v8 = vperm.slane %v1006_v3, 3  ;;  %v292_v9 = vperm.slane %v1006_v3, 2  ;;  %v103_v23 = vld [vmem:[%s2005_s0 + $0x20] sm:$0xff]  ;;  %v104_v24 = vld [vmem:[%s2005_s0 + $0x70] sm:$0xff] }
   0x4   :  { %118 = vrot.lane.b32.xlu1 %v112_v1, %s1031_s19  ;;  %114 = vrot.lane.b32.xlu0 %v110_v2, %s1031_s19  ;;  %v1025_v10 = vld [vmem:[%s2004_s1 + $0x20] ss:$8 sm:$0xf]  ;;  %v2020_v17 = vmax.f32 %v1081_v15, 0.0  ;;  %v2018_v18 = vmax.f32 %v1086_v16, 0.0  ;;  %v105_v25 = vmax.f32 %v103_v23, 0.0 }
   0x5   :  { %294 = vrot.lane.b32.xlu2 %v290_v4, %s1031_s19  ;;  %v616_v11 = vperm.slane %v1025_v10, 0  ;;  %v617_v12 = vperm.slane %v1025_v10, 1  ;;  %v618_v13 = vperm.slane %v1025_v10, 2  ;;  %v619_v14 = vperm.slane %v1025_v10, 3  ;;  %v1105_v27 = vld [vmem:[%s2005_s0 + $0x140] sm:$0xff]  ;;  %v1110_v29 = vld [vmem:[%s2005_s0 + $0x190] sm:$0xff] }
   0x6   :  { %v106_v26 = vmax.f32 %v104_v24, 0.0  ;;  %v1004_v32 = vld [vmem:[%s2005_s0 + $0x160] sm:$0xff]  ;;  %v2017_v33 = vmax.f32 %v1105_v27, 0.0  ;;  %v2014_v34 = vmax.f32 %v1110_v29, 0.0  ;;  %v1005_v40 = vld [vmem:[%s2005_s0 + $0x1b0] sm:$0xff]  ;;  %v1139_v45 = vld [vmem:[%s2005_s0 + $0x18] sm:$0xff] }
   0x7   :  { %v285_v35 = vmax.f32 %v1004_v32, 0.0  ;;  %v1132_v42 = vld [vmem:[%s2005_s0 + $0x10] sm:$0xff]  ;;  %v286_v44 = vmax.f32 %v1005_v40, 0.0  ;;  %v2023_v48 = vmax.f32 %v1139_v45, 0.0  ;;  %v1152_v52 = vld [vmem:[%s2005_s0 + $0x8] sm:$0xff]  ;;  %v1164_v55 = vld [vmem:[%s2005_s0 + $0x58] sm:$0xff] }
   0x8   :  { %v2024_v46 = vmax.f32 %v1132_v42, 0.0  ;;  %v1159_v54 = vld [vmem:[%s2005_s0 + $0x68] sm:$0xff]  ;;  %v2019_v57 = vmax.f32 %v1152_v52, 0.0  ;;  %v2013_v59 = vmax.f32 %v1164_v55, 0.0  ;;  %v1180_v63 = vld [vmem:[%s2005_s0 + $0x60] sm:$0xff]  ;;  %v1192_v2 = vld [vmem:[%s2005_s0 + $0x150] sm:$0xff] }
   0x9   :  { %v2026_v58 = vmax.f32 %v1159_v54, 0.0  ;;  %v1187_v1 = vld [vmem:[%s2005_s0 + $0x148] sm:$0xff]  ;;  %v2012_v4 = vmax.f32 %v1180_v63, 0.0  ;;  %vm901_vm11 = vcmask 1041408  }
   0xa   :  { %v1241_v23 = vld [vmem:[%s2005_s0 + $0x28] sm:$0x1] }
   0xc   :  { %120 = vrot.lane.b32.xlu1 %v113_v5, %s1031_s19  ;;  %116 = vrot.lane.b32.xlu0 %v111_v6, %s1031_s19  ;;  %v2015_v5 = vmax.f32 %v1187_v1, 0.0 }
   0xd   :  { %296 = vrot.lane.b32.xlu2 %v291_v7, %s1031_s19 }
  0x14   :  { %300 = vrot.lane.b32.xlu1 %v293_v8, %s1031_s19  ;;  %298 = vrot.lane.b32.xlu0 %v292_v9, %s1031_s19  ;;  %v2021_v8 = vmax.f32 %v1192_v2, 0.0 }
  0x15   :  { %620 = vrot.lane.b32.xlu2 %v616_v11, %s1031_s19 }
  0x1c   :  { %622 = vrot.lane.b32.xlu0 %v617_v12, %s1031_s19  ;;  %624 = vrot.lane.b32.xlu1 %v618_v13, %s1031_s19  ;;  %v1211_v12 = vld [vmem:[%s2005_s0 + $0x158] sm:$0xff]  ;;  %v1216_v13 = vld [vmem:[%s2005_s0 + $0x1a0] sm:$0xff] }
  0x1d   :  { %626 = vrot.lane.b32.xlu2 %v619_v14, %s1031_s19  ;;  %v1221_v14 = vld [vmem:[%s2005_s0 + $0x1a8] sm:$0xff]  ;;  %v2022_v24 = vmax.f32 %v1211_v12, 0.0 }
  0x5f   :  { %v295_v36 = vpop.permute.xlu2 %294 }
  0x60   :  { %v310_v37 = vmul.f32 %v295_v36, %v2017_v33  ;;  %v315_v38 = vmul.f32 %v295_v36, %v2014_v34 }
  0x67   :  { %v297_v56 = vpop.permute.xlu2 %296 }
  0x68   :  { %v302_v6 = vsel %vm122_vm0, %v295_v36, %v297_v56  ;;  %v394_v36 = vmax.f32 %v1241_v23, 0.0 }
  0x69   :  { %v311_v11 = vmul.f32 %v302_v6, %v2015_v5 }
  0x6f   :  { %v1197_v3 = vpop.permute.xlu2 %620 }
  0x76   :  { %v119_v19 = vpop.permute.xlu1 %118  ;;  %v115_v20 = vpop.permute.xlu0 %114 }
  0x77   :  { %v131_v21 = vmul.f32 %v115_v20, %v2020_v17  ;;  %v136_v22 = vmul.f32 %v115_v20, %v2018_v18  ;;  %v1249_v32 = vpop.permute.xlu2 %626 }
  0x79   :  { %161 = vrot.lane.b32.xlu2 %v136_v22, %s1031_s19  ;;  %151 = vrot.lane.b32.xlu0 %v131_v21, %s1031_s19  ;;  %v606_v21 = vld [vmem:[%s2005_s0 + $0x48] sm:$0x1]  ;;  %v1236_v22 = vld [vmem:[%s2005_s0] sm:$0xfe] }
  0x7e   :  { %v121_v28 = vpop.permute.xlu1 %120  ;;  %v117_v43 = vpop.permute.xlu0 %116 }
  0x7f   :  { %v135_v30 = vmul.f32 %v121_v28, %v105_v25  ;;  %v140_v31 = vmul.f32 %v121_v28, %v106_v26  ;;  %v124_v47 = vsel %vm122_vm0, %v117_v43, %v119_v19  ;;  %v125_v49 = vsel %vm122_vm0, %v119_v19, %v121_v28 }
  0x80   :  { %v133_v51 = vmul.f32 %v124_v47, %v2024_v46  ;;  %v134_v53 = vmul.f32 %v125_v49, %v2023_v48  ;;  %v123_v60 = vsel %vm122_vm0, %v115_v20, %v117_v43  ;;  %v139_v62 = vmul.f32 %v125_v49, %v2026_v58  ;;  %v605_v20 = vld [vmem:[%s2005_s0 + $0x20] sm:$0xfe] }
  0x81   :  { %159 = vrot.lane.b32.xlu1 %v135_v30, %s1031_s19  ;;  %169 = vrot.lane.b32.xlu0 %v140_v31, %s1031_s19  ;;  %v132_v61 = vmul.f32 %v123_v60, %v2019_v57  ;;  %v137_v0 = vmul.f32 %v123_v60, %v2013_v59  ;;  %v138_v10 = vmul.f32 %v124_v47, %v2012_v4  ;;  %v2009_v25 = vmax.f32 %v1216_v13, 0.0  ;;  %v1298_v60 = vld [vmem:[%s2005_s0 + $0x8] sm:$0xfe] }
  0x82   :  { %v609_v26 = vmax.f32 %v605_v20, 0.0  ;;  %v610_v28 = vmax.f32 %v606_v21, 0.0  ;;  %v2025_v30 = vmax.f32 %v1221_v14, 0.0  ;;  %v641_v49 = vmul.f32 %v1197_v3, %v394_v36 }
  0x84   :  { %v677_v21 = vrot.slane %v641_v49, 1 }
  0x86   :  { %v1123_v39 = vpop.permute.xlu1 %300  ;;  %v299_v7 = vpop.permute.xlu0 %298 }
  0x87   :  { %v314_v41 = vmul.f32 %v1123_v39, %v285_v35  ;;  %v319_v50 = vmul.f32 %v1123_v39, %v286_v44  ;;  %v303_v9 = vsel %vm122_vm0, %v297_v56, %v299_v7  ;;  %v304_v31 = vsel %vm122_vm0, %v299_v7, %v1123_v39  ;;  %v1269_v44 = vld [vmem:[%s2005_s0 + $0x18] sm:$0xfe] }
  0x88   :  { %v312_v19 = vmul.f32 %v303_v9, %v2021_v8  ;;  %v390_v35 = vmax.f32 %v1236_v22, 0.0  ;;  %v317_v40 = vmul.f32 %v303_v9, %v2009_v25  ;;  %v645_v39 = vmul.f32 %v1249_v32, %v610_v28  ;;  %v1340_v25 = vld [vmem:[%s2005_s0 + $0x38] sm:$0x1] }
  0x89   :  { %330 = vrot.lane.b32.xlu1 %v310_v37, %s1031_s19  ;;  %338 = vrot.lane.b32.xlu2 %v314_v41, %s1031_s19  ;;  %v1256_v37 = vld [vmem:[%s2005_s0 + $0x198] sm:$0xff]  ;;  %v640_v41 = vmul.f32 %v1249_v32, %v609_v26  ;;  %v318_v43 = vmul.f32 %v304_v31, %v2025_v30  ;;  %v393_v7 = vmax.f32 %v1269_v44, 0.0  ;;  %v391_v28 = vmax.f32 %v1298_v60, 0.0  ;;  %v1381_v30 = vld [vmem:[%s2005_s0 + $0x68] sm:$0xfe] }
  0x8a   :  { %340 = vrot.lane.b32.xlu0 %v315_v38, %s1031_s19  ;;  %v313_v38 = vmul.f32 %v304_v31, %v2022_v24  ;;  %v636_v47 = vmul.f32 %v1197_v3, %v390_v35  ;;  %v2010_v56 = vmax.f32 %v1256_v37, 0.0 }
  0x8b   :  { %v688_v9 = vrot.slane %v640_v41, 1 }
  0x8c   :  { %v676_v20 = vrot.slane %v636_v47, 1  ;;  %v316_v41 = vmul.f32 %v302_v6, %v2010_v56  ;;  %v1335_v6 = vld [vmem:[%s2005_s0 + $0x10] sm:$0xfe]  ;;  %v1345_v56 = vld [vmem:[%s2005_s0 + $0x60] sm:$0xfe] }
  0x8d   :  { %v2030_v33 = vmax.f32 %v1345_v56, 0.0  ;;  %v2038_v44 = vmax.f32 %v1345_v56, 0.0 }
  0x91   :  { %348 = vrot.lane.b32.xlu1 %v319_v50, %s1031_s19  ;;  %155 = vrot.lane.b32.xlu2 %v133_v51, %s1031_s19  ;;  %v1280_v50 = vld [vmem:[%s2005_s0 + $0x50] sm:$0xfe]  ;;  %v1287_v51 = vld [vmem:[%s2005_s0 + $0x40] sm:$0x1] }
  0x92   :  { %157 = vrot.lane.b32.xlu0 %v134_v53, %s1031_s19  ;;  %v1292_v53 = vld [vmem:[%s2005_s0 + $0x78] sm:$0x1] }
  0x93   :  { %v2016_v26 = vmax.f32 %v1292_v53, 0.0 }
  0x95   :  { %v651_v4 = vmul.f32 %v1197_v3, %v2016_v26  ;;  %v396_v26 = vmax.f32 %v1340_v25, 0.0 }
  0x97   :  { %v692_v57 = vrot.slane %v651_v4, 1  ;;  %v1386_v4 = vld [vmem:[%s2005_s0 + $0x90] sm:$0x1] }
  0x99   :  { %167 = vrot.lane.b32.xlu2 %v139_v62, %s1031_s19  ;;  %153 = vrot.lane.b32.xlu1 %v132_v61, %s1031_s19  ;;  %v1303_v61 = vld [vmem:[%s2005_s0 + $0x30] sm:$0x1]  ;;  %v625_v62 = vpop.permute.xlu1 %624 }
  0x9a   :  { %163 = vrot.lane.b32.xlu0 %v137_v0, %s1031_s19  ;;  %v623_v0 = vpop.permute.xlu0 %622  ;;  %v395_v31 = vmax.f32 %v1303_v61, 0.0  ;;  %v1457_v61 = vld [vmem:[%s2004_s1] ss:$8 sm:$0xf] }
  0x9b   :  { %v629_v8 = vsel %vm122_vm0, %v623_v0, %v625_v62 }
  0xa1   :  { %332 = vrot.lane.b32.xlu2 %v311_v11, %s1031_s19  ;;  %165 = vrot.lane.b32.xlu1 %v138_v10, %s1031_s19  ;;  %v689_v10 = vrot.slane %v645_v39, 1  ;;  %v2011_v11 = vmax.f32 %v1280_v50, 0.0  ;;  %v1321_v39 = vld [vmem:[%s2005_s0 + $0x58] sm:$0xfe] }
  0xa2   :  { %334 = vrot.lane.b32.xlu0 %v312_v19, %s1031_s19  ;;  %v2031_v19 = vmax.f32 %v1287_v51, 0.0  ;;  %v2028_v5 = vmax.f32 %v1321_v39, 0.0 }
  0xa3   :  { %v690_v47 = vsel %vm449_vm1, %v688_v9, %v689_v10  ;;  %v646_v49 = vmul.f32 %v1197_v3, %v2011_v11  ;;  %v678_v11 = vsel %vm449_vm1, %v676_v20, %v677_v21  ;;  %v1365_v20 = vld [vmem:[%s2005_s0 + $0x88] sm:$0x1]  ;;  %v392_v21 = vmax.f32 %v1335_v6, 0.0  ;;  %v1471_v6 = vld [vmem:[%s2004_s1 + $0x1] ss:$8 sm:$0xf] }
  0xa4   :  { %v2029_v17 = vmax.f32 %v1365_v20, 0.0 }
  0xa9   :  { %344 = vrot.lane.b32.xlu2 %v317_v40, %s1031_s19  ;;  %336 = vrot.lane.b32.xlu1 %v313_v38, %s1031_s19  ;;  %v630_v38 = vsel %vm122_vm0, %v625_v62, %v1249_v32  ;;  %v628_v40 = vsel %vm122_vm0, %v1197_v3, %v623_v0 }
  0xaa   :  { %346 = vrot.lane.b32.xlu0 %v318_v43, %s1031_s19  ;;  %v1326_v43 = vld [vmem:[%s2005_s0 + $0x80] sm:$0x1]  ;;  %v639_v9 = vmul.f32 %v630_v38, %v393_v7  ;;  %v644_v10 = vmul.f32 %v630_v38, %v2031_v19  ;;  %v637_v59 = vmul.f32 %v628_v40, %v391_v28  ;;  %v642_v34 = vmul.f32 %v628_v40, %v395_v31 }
  0xab   :  { %v2027_v3 = vmax.f32 %v1326_v43, 0.0 }
  0xac   :  { %v686_v18 = vrot.slane %v644_v10, 1  ;;  %v679_v24 = vrot.slane %v637_v59, 1  ;;  %v680_v48 = vrot.slane %v642_v34, 1  ;;  %v638_v59 = vmul.f32 %v629_v8, %v392_v21  ;;  %v607_v10 = vld [vmem:[%s2005_s0 + $0x70] sm:$0xfe] }
  0xad   :  { %v652_v46 = vmul.f32 %v628_v40, %v2027_v3  ;;  %v643_v34 = vmul.f32 %v629_v8, %v396_v26  ;;  %v611_v58 = vmax.f32 %v607_v10, 0.0 }
  0xb1   :  { %706 = vrot.lane.b32.xlu2 %v678_v11, %s1031_s19  ;;  %342 = vrot.lane.b32.xlu1 %v316_v41, %s1031_s19  ;;  %v685_v11 = vrot.slane %v639_v9, 1  ;;  %v691_v41 = vrot.slane %v646_v49, 1  ;;  %v653_v49 = vmul.f32 %v629_v8, %v2029_v17  ;;  %v681_v9 = vsel %vm449_vm1, %v679_v24, %v680_v48 }
  0xb2   :  { %714 = vrot.lane.b32.xlu0 %v690_v47, %s1031_s19  ;;  %v647_v47 = vmul.f32 %v628_v40, %v2028_v5  ;;  %v648_v40 = vmul.f32 %v629_v8, %v2030_v33  ;;  %v405_v8 = vmax.f32 %v1386_v4, 0.0 }
  0xb3   :  { %v687_v62 = vsel %vm449_vm1, %v685_v11, %v686_v18  ;;  %v693_v0 = vsel %vm449_vm1, %v691_v41, %v692_v57  ;;  %v608_v18 = vld [vmem:[%s2005_s0 + $0x98] sm:$0x1]  ;;  %v401_v57 = vmax.f32 %v1381_v30, 0.0  ;;  %v695_v41 = vrot.slane %v652_v46, 1 }
  0xb4   :  { %v694_v11 = vrot.slane %v647_v47, 1  ;;  %v612_v48 = vmax.f32 %v608_v18, 0.0  ;;  %v697_v24 = vrot.slane %v648_v40, 1  ;;  %v698_v3 = vrot.slane %v653_v49, 1 }
  0xb5   :  { %v649_v5 = vmul.f32 %v630_v38, %v401_v57  ;;  %v654_v17 = vmul.f32 %v630_v38, %v405_v8 }
  0xb6   :  { %v696_v33 = vsel %vm449_vm1, %v694_v11, %v695_v41  ;;  %v655_v30 = vmul.f32 %v1249_v32, %v612_v48  ;;  %v699_v46 = vsel %vm449_vm1, %v697_v24, %v698_v3 }
  0xb7   :  { %v701_v38 = vrot.slane %v654_v17, 1 }
  0xb8   :  { %v704_v4 = vrot.slane %v655_v30, 1 }
  0xb9   :  { %712 = vrot.lane.b32.xlu2 %v687_v62, %s1031_s19  ;;  %716 = vrot.lane.b32.xlu1 %v693_v0, %s1031_s19  ;;  %v682_v62 = vrot.slane %v638_v59, 1  ;;  %v683_v0 = vrot.slane %v643_v34, 1  ;;  %v700_v59 = vrot.slane %v649_v5, 1 }
  0xba   :  { %708 = vrot.lane.b32.xlu0 %v681_v9, %s1031_s19  ;;  %v650_v9 = vmul.f32 %v1249_v32, %v611_v58  ;;  %v1007_v32 = vld [vmem:[%s2004_s1 + $0x6] ss:$8 sm:$0xf] }
  0xbb   :  { %v684_v19 = vsel %vm449_vm1, %v682_v62, %v683_v0  ;;  %v702_v40 = vsel %vm449_vm1, %v700_v59, %v701_v38  ;;  %v410_v17 = vperm.slane %v1007_v32, 1  ;;  %v411_v0 = vperm.slane %v1007_v32, 2 }
  0xbc   :  { %v703_v47 = vrot.slane %v650_v9, 1  ;;  %v412_v48 = vperm.slane %v1007_v32, 3  ;;  %v2036_v9 = vmax.f32 %v1287_v51, 0.0  ;;  %v38_v59 = vperm.slane %v1457_v61, 3 }
  0xbd   :  { %v418_v18 = vmul.f32 %v410_v17, %v391_v28  ;;  %v422_v11 = vmul.f32 %v410_v17, %v395_v31  ;;  %v419_v60 = vmul.f32 %v411_v0, %v392_v21  ;;  %v423_v31 = vmul.f32 %v411_v0, %v396_v26 }
  0xbe   :  { %v705_v34 = vsel %vm449_vm1, %v703_v47, %v704_v4  ;;  %v420_v28 = vmul.f32 %v412_v48, %v393_v7  ;;  %v424_v30 = vmul.f32 %v412_v48, %v2036_v9  ;;  %v427_v7 = vmul.f32 %v411_v0, %v2038_v44 }
  0xbf   :  { %v454_v23 = vrot.slane %v422_v11, 1  ;;  %v428_v25 = vmul.f32 %v412_v48, %v401_v57  ;;  %v2039_v26 = vmax.f32 %v1365_v20, 0.0  ;;  %v432_v4 = vmul.f32 %v412_v48, %v405_v8  ;;  %v1491_v20 = vld [vmem:[%s2004_s1 + $0x3] ss:$8 sm:$0xf] }
  0xc0   :  { %v468_v11 = vrot.slane %v427_v7, 1  ;;  %v978_v48 = vld [vmem:[%s2005_s0 + $0xb0] sm:$0xff]  ;;  %v2044_v9 = vmax.f32 %v1159_v54, 0.0  ;;  %v218_v44 = vperm.slane %v1491_v20, 3  ;;  %v2033_v7 = vperm.slane %v1457_v61, 2 }
  0xc1   :  { %718 = vrot.lane.b32.xlu2 %v696_v33, %s1031_s19  ;;  %710 = vrot.lane.b32.xlu1 %v684_v19, %s1031_s19  ;;  %v1429_v19 = vperm.slane %v1007_v32, 0  ;;  %v431_v51 = vmul.f32 %v411_v0, %v2039_v26  ;;  %v456_v32 = vrot.slane %v419_v60, 1  ;;  %v472_v60 = vrot.slane %v432_v4, 1  ;;  %v1519_v26 = vld [vmem:[%s2004_s1 + $0x4] ss:$8 sm:$0xf] }
  0xc2   :  { %720 = vrot.lane.b32.xlu0 %v699_v46, %s1031_s19  ;;  %v983_v46 = vld [vmem:[%s2005_s0 + $0x108] sm:$0xff]  ;;  %v2032_v54 = vperm.slane %v1471_v6, 2 }
  0xc3   :  { %v417_v3 = vmul.f32 %v1429_v19, %v390_v35  ;;  %v421_v49 = vmul.f32 %v1429_v19, %v394_v36  ;;  %v453_v35 = vrot.slane %v418_v18, 1  ;;  %v75_v38 = vmax.f32 %v983_v46, 0.0 }
  0xc4   :  { %v460_v18 = vrot.slane %v424_v30, 1  ;;  %v50_v30 = vmul.f32 %v38_v59, %v2044_v9 }
  0xc5   :  { %v450_v41 = vrot.slane %v417_v3, 1  ;;  %v451_v62 = vrot.slane %v421_v49, 1  ;;  %v1474_v21 = vsel %vm449_vm1, %v453_v35, %v454_v23  ;;  %v457_v3 = vrot.slane %v423_v31, 1  ;;  %v979_v35 = vld [vmem:[%s2005_s0 + $0xb8] sm:$0xff] }
  0xc6   :  { %2037 = vst [vmem:[#allocation3_spill] sm:$0xff] %v1474_v21  ;;  %v459_v49 = vrot.slane %v420_v28, 1  ;;  %v471_v23 = vrot.slane %v428_v25, 1  ;;  %v2043_v28 = vmax.f32 %v1326_v43, 0.0  ;;  %v70_v43 = vmax.f32 %v978_v48, 0.0 }
  0xc7   :  { %v1450_v36 = vsel %vm449_vm1, %v450_v41, %v451_v62  ;;  %v1494_v57 = vsel %vm449_vm1, %v456_v32, %v457_v3  ;;  %v469_v41 = vrot.slane %v431_v51, 1  ;;  %v2042_v62 = vmax.f32 %v1321_v39, 0.0  ;;  %v1002_v51 = vld [vmem:[%s2005_s0 + $0x248] sm:$0xff]  ;;  %v997_v3 = vld [vmem:[%s2005_s0 + $0x1f0] sm:$0xff] }
  0xc8   :  { %2035 = vst [vmem:[#allocation2_spill] sm:$0xff] %v1450_v36  ;;  %v1497_v8 = vsel %vm449_vm1, %v459_v49, %v460_v18  ;;  %v430_v31 = vmul.f32 %v410_v17, %v2043_v28  ;;  %v1522_v25 = vsel %vm449_vm1, %v471_v23, %v472_v60  ;;  %v976_v23 = vld [vmem:[%s2005_s0 + $0xa0] sm:$0xff]  ;;  %v262_v60 = vperm.slane %v1519_v26, 3 }
  0xc9   :  { %724 = vrot.lane.b32.xlu2 %v705_v34, %s1031_s19  ;;  %722 = vrot.lane.b32.xlu1 %v702_v40, %s1031_s19  ;;  %v82_v34 = vperm.slane %v1471_v6, 3  ;;  %2041 = vst [vmem:[#allocation5_spill] sm:$0xff] %v1494_v57  ;;  %v426_v0 = vmul.f32 %v410_v17, %v2042_v62  ;;  %v1512_v39 = vsel %vm449_vm1, %v468_v11, %v469_v41  ;;  %v71_v17 = vmax.f32 %v979_v35, 0.0 }
  0xca   :  { %2045 = vst [vmem:[#allocation6_spill] sm:$0xff] %v1512_v39  ;;  %v466_v18 = vrot.slane %v430_v31, 1  ;;  %v2048_v11 = vmax.f32 %v1221_v14, 0.0  ;;  %v2049_v62 = vmax.f32 %v1132_v42, 0.0  ;;  %v255_v14 = vmax.f32 %v1002_v51, 0.0 }
  0xcb   :  { %v94_v46 = vmul.f32 %v82_v34, %v75_v38  ;;  %2046 = vst [vmem:[#allocation7_spill] sm:$0xff] %v1522_v25  ;;  %v465_v49 = vrot.slane %v426_v0, 1  ;;  %v998_v0 = vld [vmem:[%s2005_s0 + $0x1f8] sm:$0xff]  ;;  %v2050_v28 = vmax.f32 %v1139_v45, 0.0  ;;  %v89_v42 = vmul.f32 %v2032_v54, %v70_v43 }
  0xcc   :  { %v1539_v41 = vmul.f32 %v218_v44, %v2048_v11  ;;  %v45_v48 = vmul.f32 %v2033_v7, %v2049_v62  ;;  %v90_v9 = vmul.f32 %v82_v34, %v71_v17  ;;  %v980_v11 = vld [vmem:[%s2005_s0 + $0xf0] sm:$0xff]  ;;  %v35_v62 = vperm.slane %v1457_v61, 0 }
  0xcd   :  { %v1528_v4 = vadd.f32 %v94_v46, %v50_v30  ;;  %v46_v31 = vmul.f32 %v38_v59, %v2050_v28  ;;  %v977_v46 = vld [vmem:[%s2005_s0 + $0xa8] sm:$0xff]  ;;  %v250_v51 = vmax.f32 %v997_v3, 0.0  ;;  %v1568_v59 = vsel %vm449_vm1, %v465_v49, %v466_v18  ;;  %v995_v18 = vld [vmem:[%s2005_s0 + $0x1e0] sm:$0xff] }
  0xce   :  { %2051 = vst [vmem:[#allocation9_spill] sm:$0xff] %v1568_v59  ;;  %v36_v34 = vperm.slane %v1457_v61, 1  ;;  %v68_v43 = vmax.f32 %v976_v23, 0.0  ;;  %v79_v17 = vperm.slane %v1471_v6, 0  ;;  %v251_v28 = vmax.f32 %v998_v0, 0.0 }
  0xcf   :  { %v69_v54 = vmax.f32 %v977_v46, 0.0  ;;  %v80_v7 = vperm.slane %v1471_v6, 1  ;;  %v72_v30 = vmax.f32 %v980_v11, 0.0  ;;  %v1573_v25 = vmul.f32 %v262_v60, %v255_v14 }
  0xd0   :  { %v1575_v39 = vadd.f32 %v89_v42, %v45_v48  ;;  %v98_v3 = vadd.f32 %v90_v9, %v46_v31  ;;  %v2053_v45 = vmax.f32 %v1211_v12, 0.0  ;;  %v215_v49 = vperm.slane %v1491_v20, 0  ;;  %v996_v12 = vld [vmem:[%s2005_s0 + $0x1e8] sm:$0xff]  ;;  %v1008_v48 = vld [vmem:[%s2005_s0 + $0xa0] sm:$0xfe] }
  0xd1   :  { %v2054_v23 = vmax.f32 %v1192_v2, 0.0  ;;  %v2055_v0 = vperm.slane %v1491_v20, 2  ;;  %v2057_v14 = vmax.f32 %v1081_v15, 0.0  ;;  %v999_v2 = vld [vmem:[%s2005_s0 + $0x230] sm:$0xff]  ;;  %v87_v9 = vmul.f32 %v79_v17, %v68_v43 }
  0xd2   :  { %2052 = vst [vmem:[#allocation10_spill] sm:$0xff] %v1575_v39  ;;  %v1579_v57 = vmul.f32 %v218_v44, %v2053_v45  ;;  %v2058_v44 = vperm.slane %v1519_v26, 2  ;;  %v2060_v45 = vmax.f32 %v1152_v52, 0.0  ;;  %v2061_v15 = vmax.f32 %v1086_v16, 0.0 }
  0xd3   :  { %v1422_v58 = vpop.permute.xlu2 %161  ;;  %v1589_v46 = vmul.f32 %v2055_v0, %v2054_v23  ;;  %v43_v31 = vmul.f32 %v35_v62, %v2057_v14  ;;  %v981_v14 = vld [vmem:[%s2005_s0 + $0xf8] sm:$0xff]  ;;  %v88_v52 = vmul.f32 %v80_v7, %v69_v54  ;;  %v259_v16 = vperm.slane %v1519_v26, 0 }
  0xd4   :  { %v1599_v42 = vmul.f32 %v2058_v44, %v250_v51  ;;  %v44_v23 = vmul.f32 %v36_v34, %v2060_v45  ;;  %v47_v0 = vmul.f32 %v35_v62, %v2061_v15  ;;  %v982_v51 = vld [vmem:[%s2005_s0 + $0x100] sm:$0xff]  ;;  %v1616_v44 = vmul.f32 %v262_v60, %v251_v28  ;;  %v1012_v60 = vld [vmem:[%s2005_s0 + $0xc8] sm:$0x1] }
  0xd5   :  { %2056 = vst [vmem:[#allocation11_spill] sm:$0xff] %v1589_v46  ;;  %v1621_v43 = vld [vmem:[%s2004_s1 + $0x7] ss:$8 sm:$0xf]  ;;  %v248_v45 = vmax.f32 %v995_v18, 0.0  ;;  %v91_v62 = vmul.f32 %v79_v17, %v72_v30  ;;  %v2063_v59 = vmax.f32 %v1105_v27, 0.0 }
  0xd6   :  { %2059 = vst [vmem:[#allocation12_spill] sm:$0xff] %v1599_v42  ;;  %v249_v54 = vmax.f32 %v996_v12, 0.0  ;;  %v260_v18 = vperm.slane %v1519_v26, 1  ;;  %v252_v30 = vmax.f32 %v999_v2, 0.0  ;;  %v2064_v21 = vmax.f32 %v1187_v1, 0.0 }
  0xd7   :  { %v2065_v42 = vperm.slane %v1491_v20, 1  ;;  %v73_v46 = vmax.f32 %v981_v14, 0.0  ;;  %v1649_v27 = vperm.slane %v1621_v43, 0  ;;  %v510_v12 = vmax.f32 %v1012_v60, 0.0 }
  0xd8   :  { %v1654_v39 = vmul.f32 %v259_v16, %v248_v45  ;;  %v99_v1 = vadd.f32 %v91_v62, %v47_v0  ;;  %v1674_v0 = vmul.f32 %v259_v16, %v252_v30  ;;  %v2068_v14 = vmax.f32 %v1180_v63, 0.0  ;;  %v1011_v16 = vld [vmem:[%s2005_s0 + $0xb8] sm:$0xfe] }
  0xd9   :  { %v1646_v36 = vmul.f32 %v2065_v42, %v2064_v21  ;;  %v1009_v21 = vld [vmem:[%s2005_s0 + $0xa8] sm:$0xfe]  ;;  %v2066_v42 = vmax.f32 %v1110_v29, 0.0  ;;  %v2067_v29 = vmax.f32 %v1164_v55, 0.0  ;;  %v92_v45 = vmul.f32 %v80_v7, %v73_v46  ;;  %v1015_v55 = vld [vmem:[%s2005_s0 + $0xe0] sm:$0x1] }
  0xda   :  { %v2070_v62 = vperm.slane %v1471_v6, 2 }
  0xe3   :  { %v1424_v33 = vpop.permute.xlu2 %338 }
  0xeb   :  { %v1431_v5 = vpop.permute.xlu0 %151  ;;  %v1439_v10 = vpop.permute.xlu2 %155 }
  0xf3   :  { %v1445_v24 = vpop.permute.xlu1 %159  ;;  %v1447_v22 = vpop.permute.xlu0 %169 }
  0xf4   :  { %v1480_v47 = vpop.permute.xlu2 %167 }
  0xf5   :  { %v178_v17 = vsel %vm122_vm0, %v1480_v47, %v1447_v22  ;;  %v1656_v22 = vadd.f32 %v88_v52, %v44_v23  ;;  %v1000_v23 = vld [vmem:[%s2005_s0 + $0x238] sm:$0xff] }
  0xf6   :  { %v253_v46 = vmax.f32 %v1000_v23, 0.0 }
  0xfb   :  { %v1484_v40 = vpop.permute.xlu1 %330 }
  0xfc   :  { %v1486_v56 = vpop.permute.xlu0 %340  ;;  %v1530_v38 = vpop.permute.xlu2 %332 }
  0xfd   :  { %2040 = vst [vmem:[#allocation4_spill] sm:$0xff] %v1486_v56  ;;  %v95_v56 = vadd.f32 %v87_v9, %v43_v31  ;;  %v194_v31 = vadd.f32 %v178_v17, %v1528_v4  ;;  %v1664_v9 = vmul.f32 %v215_v49, %v2066_v42  ;;  %v1013_v4 = vld [vmem:[%s2005_s0 + $0xd0] sm:$0x1]  ;;  %v1700_v17 = vperm.slane %v1621_v43, 1 }
  0xfe   :  { %v509_v42 = vmax.f32 %v1011_v16, 0.0 }
 0x103   :  { %v1532_v32 = vpop.permute.xlu1 %348 }
 0x104   :  { %2047 = vst [vmem:[#allocation8_spill] sm:$0xff] %v1532_v32  ;;  %v1545_v35 = vpop.permute.xlu0 %157  ;;  %v1632_v28 = vpop.permute.xlu2 %344  ;;  %v1636_v32 = vmul.f32 %v215_v49, %v2063_v59  ;;  %v506_v59 = vmax.f32 %v1008_v48, 0.0  ;;  %v1666_v48 = vmul.f32 %v260_v18, %v249_v54  ;;  %v48_v49 = vmul.f32 %v36_v34, %v2067_v29 }
 0x105   :  { %2062 = vst [vmem:[#allocation13_spill] sm:$0xff] %v1632_v28  ;;  %v74_v28 = vmax.f32 %v982_v51, 0.0  ;;  %v174_v2 = vsel %vm122_vm0, %v1545_v35, %v1445_v24  ;;  %v1001_v24 = vld [vmem:[%s2005_s0 + $0x240] sm:$0xff]  ;;  %v2069_v51 = vperm.slane %v1457_v61, 2  ;;  %v537_v61 = vmul.f32 %v1649_v27, %v510_v12 }
 0x106   :  { %v190_v54 = vadd.f32 %v174_v2, %v98_v3  ;;  %v533_v63 = vmul.f32 %v1649_v27, %v506_v59  ;;  %v507_v34 = vmax.f32 %v1009_v21, 0.0  ;;  %v254_v6 = vmax.f32 %v1001_v24, 0.0 }
 0x107   :  { %v49_v52 = vmul.f32 %v2069_v51, %v2068_v14  ;;  %v93_v60 = vmul.f32 %v2070_v62, %v74_v28  ;;  %v511_v28 = vmax.f32 %v1013_v4, 0.0  ;;  %v238_v3 = vadd.f32 %v1539_v41, %v194_v31 }
 0x108   :  { %v1707_v59 = vperm.slane %v1621_v43, 3  ;;  %v100_v12 = vadd.f32 %v92_v45, %v48_v49  ;;  %v2071_v21 = vmax.f32 %v1256_v37, 0.0  ;;  %v2072_v24 = vperm.slane %v1491_v20, 1 }
 0x109   :  { %v2073_v4 = vmax.f32 %v1216_v13, 0.0  ;;  %v2074_v29 = vperm.slane %v1491_v20, 2  ;;  %v513_v31 = vmax.f32 %v1015_v55, 0.0  ;;  %v1724_v51 = vadd.f32 %v93_v60, %v49_v52 }
 0x10a   :  { %v1713_v23 = vmul.f32 %v2072_v24, %v2071_v21  ;;  %v565_v49 = vrot.slane %v533_v63, 1  ;;  %v566_v45 = vrot.slane %v537_v61, 1  ;;  %v2075_v13 = vperm.slane %v1519_v26, 2 }
 0x10b   :  { %v1604_v11 = vpop.permute.xlu1 %153  ;;  %v1719_v41 = vmul.f32 %v2074_v29, %v2073_v4  ;;  %v1733_v20 = vmul.f32 %v260_v18, %v253_v46  ;;  %v1739_v52 = vadd.f32 %v1573_v25, %v238_v3  ;;  %v1742_v60 = vmul.f32 %v1707_v59, %v509_v42 }
 0x10c   :  { %v1624_v15 = vpop.permute.xlu0 %163  ;;  %v171_v2 = vsel %vm122_vm0, %v1431_v5, %v1604_v11  ;;  %v234_v5 = vadd.f32 %v1579_v57, %v190_v54  ;;  %v1722_v14 = vpop.permute.xlu2 %706  ;;  %v1731_v16 = vmul.f32 %v2075_v13, %v254_v6  ;;  %v1016_v57 = vld [vmem:[%s2005_s0 + $0xf0] sm:$0xfe]  ;;  %v1751_v26 = vmul.f32 %v1700_v17, %v507_v34  ;;  %v1014_v34 = vld [vmem:[%s2005_s0 + $0xd8] sm:$0x1] }
 0x10d   :  { %v187_v37 = vadd.f32 %v171_v2, %v95_v56  ;;  %v175_v62 = vsel %vm122_vm0, %v1422_v58, %v1624_v15  ;;  %v1020_v58 = vld [vmem:[%s2005_s0 + $0x118] sm:$0x1]  ;;  %v1010_v56 = vld [vmem:[%s2005_s0 + $0xb0] sm:$0xfe]  ;;  %v1754_v18 = vmul.f32 %v1700_v17, %v511_v28  ;;  %v350_v25 = vsel %vm122_vm0, %v1484_v40, %v1530_v38 }
 0x10e   :  { %v2076_v54 = vmax.f32 %v1280_v50, 0.0  ;;  %v2077_v63 = vmax.f32 %v1292_v53, 0.0  ;;  %v1766_v6 = vmul.f32 %v1707_v59, %v513_v31  ;;  %v191_v46 = vadd.f32 %v175_v62, %v99_v1 }
 0x10f   :  { %v278_v40 = vadd.f32 %v1616_v44, %v234_v5  ;;  %v514_v3 = vmax.f32 %v1016_v57, 0.0  ;;  %v1775_v50 = vsel %vm449_vm1, %v565_v49, %v566_v45  ;;  %v231_v53 = vadd.f32 %v1636_v32, %v187_v37  ;;  %v1018_v5 = vld [vmem:[%s2005_s0 + $0x100] sm:$0xfe] }
 0x110   :  { %v425_v55 = vmul.f32 %v1429_v19, %v2076_v54  ;;  %v429_v61 = vmul.f32 %v1429_v19, %v2077_v63  ;;  %v518_v42 = vmax.f32 %v1020_v58, 0.0  ;;  %v508_v21 = vmax.f32 %v1010_v56, 0.0 }
 0x111   :  { %v574_v1 = vrot.slane %v1742_v60, 1  ;;  %v512_v4 = vmax.f32 %v1014_v34, 0.0  ;;  %v527_v44 = vperm.slane %v1621_v43, 2  ;;  %v173_v29 = vsel %vm122_vm0, %v1439_v10, %v1545_v35 }
 0x112   :  { %v172_v32 = vsel %vm122_vm0, %v1604_v11, %v1439_v10  ;;  %v462_v31 = vrot.slane %v425_v55, 1  ;;  %v235_v49 = vadd.f32 %v1664_v9, %v191_v46  ;;  %v541_v35 = vmul.f32 %v1649_v27, %v514_v3  ;;  %v1017_v10 = vld [vmem:[%s2005_s0 + $0xf8] sm:$0xfe]  ;;  %v2079_v3 = vld [vmem:[#allocation4_spill] sm:$0xff] }
 0x113   :  { %v1690_v30 = vpop.permute.xlu1 %165  ;;  %v275_v11 = vadd.f32 %v1654_v39, %v231_v53  ;;  %v575_v37 = vrot.slane %v1766_v6, 1  ;;  %v545_v62 = vmul.f32 %v1649_v27, %v518_v42  ;;  %v568_v9 = vrot.slane %v1751_v26, 1  ;;  %v1019_v26 = vld [vmem:[%s2005_s0 + $0x108] sm:$0xfe]  ;;  %v2088_v6 = vld [vmem:[#allocation6_spill] sm:$0xff] }
 0x114   :  { %v1697_v7 = vpop.permute.xlu0 %334  ;;  %v176_v43 = vsel %vm122_vm0, %v1624_v15, %v1690_v30  ;;  %v1021_v15 = vld [vmem:[%s2005_s0 + $0x120] sm:$0x1]  ;;  %v188_v57 = vadd.f32 %v172_v32, %v1656_v22  ;;  %v1814_v58 = vpop.permute.xlu2 %712  ;;  %v569_v56 = vrot.slane %v1754_v18, 1  ;;  %v516_v54 = vmax.f32 %v1018_v5, 0.0 }
 0x115   :  { %v192_v39 = vadd.f32 %v176_v43, %v100_v12  ;;  %v1817_v55 = vmul.f32 %v527_v44, %v508_v21  ;;  %v1819_v63 = vmul.f32 %v527_v44, %v512_v4  ;;  %v515_v27 = vmax.f32 %v1017_v10, 0.0  ;;  %v1022_v12 = vld [vmem:[%s2005_s0 + $0x128] sm:$0x1]  ;;  %v2081_v10 = vld [vmem:[#allocation2_spill] sm:$0xff] }
 0x116   :  { %v279_v22 = vadd.f32 %v1674_v0, %v235_v49  ;;  %v577_v46 = vrot.slane %v541_v35, 1  ;;  %v177_v18 = vsel %vm122_vm0, %v1690_v30, %v1480_v47  ;;  %v578_v42 = vrot.slane %v545_v62, 1  ;;  %v1023_v47 = vld [vmem:[%s2005_s0 + $0x130] sm:$0x1] }
 0x117   :  { %v366_v21 = vadd.f32 %v350_v25, %v275_v11  ;;  %v232_v0 = vadd.f32 %v1646_v36, %v188_v57  ;;  %v517_v32 = vmax.f32 %v1019_v26, 0.0  ;;  %v542_v5 = vmul.f32 %v1700_v17, %v515_v27 }
 0x118   :  { %v520_v30 = vmax.f32 %v1022_v12, 0.0  ;;  %v193_v49 = vadd.f32 %v177_v18, %v1724_v51  ;;  %v571_v43 = vrot.slane %v1817_v55, 1  ;;  %v572_v36 = vrot.slane %v1819_v63, 1  ;;  %v2083_v51 = vld [vmem:[#allocation13_spill] sm:$0xff] }
 0x119   :  { %v579_v35 = vsel %vm449_vm1, %v577_v46, %v578_v42  ;;  %v482_v11 = vadd.f32 %v2081_v10, %v366_v21  ;;  %v521_v57 = vmax.f32 %v1023_v47, 0.0  ;;  %v543_v55 = vmul.f32 %v527_v44, %v516_v54  ;;  %v2084_v42 = vld [vmem:[#allocation3_spill] sm:$0xff] }
 0x11a   :  { %v547_v63 = vmul.f32 %v527_v44, %v520_v30 }
 0x11b   :  { %v1771_v28 = vpop.permute.xlu1 %336  ;;  %v548_v54 = vmul.f32 %v1707_v59, %v521_v57 }
 0x11c   :  { %v353_v19 = vsel %vm122_vm0, %v1771_v28, %v1424_v33  ;;  %v1781_v2 = vpop.permute.xlu0 %346  ;;  %v463_v33 = vrot.slane %v429_v61, 1  ;;  %v719_v26 = vpop.permute.xlu2 %718 }
 0x11d   :  { %v369_v24 = vadd.f32 %v353_v19, %v278_v40  ;;  %v519_v40 = vmax.f32 %v1021_v15, 0.0  ;;  %v2082_v15 = vld [vmem:[#allocation12_spill] sm:$0xff]  ;;  %v356_v18 = vsel %vm122_vm0, %v2083_v51, %v1781_v2  ;;  %v587_v47 = vrot.slane %v548_v54, 1 }
 0x11e   :  { %v464_v61 = vsel %vm449_vm1, %v462_v31, %v463_v33  ;;  %v236_v31 = vadd.f32 %v1713_v23, %v192_v39  ;;  %v570_v33 = vsel %vm449_vm1, %v568_v9, %v569_v56  ;;  %v351_v23 = vsel %vm122_vm0, %v1530_v38, %v1697_v7 }
 0x11f   :  { %v1799_v45 = vadd.f32 %v1497_v8, %v369_v24  ;;  %v2078_v8 = vld [vmem:[#allocation10_spill] sm:$0xff]  ;;  %v2080_v24 = vld [vmem:[#allocation11_spill] sm:$0xff]  ;;  %v546_v62 = vmul.f32 %v1700_v17, %v519_v40  ;;  %v276_v9 = vadd.f32 %v1666_v48, %v232_v0  ;;  %v580_v39 = vrot.slane %v542_v5, 1 }
 0x120   :  { %v189_v13 = vadd.f32 %v173_v29, %v2078_v8  ;;  %v280_v56 = vadd.f32 %v1733_v20, %v236_v31  ;;  %v237_v38 = vadd.f32 %v1719_v41, %v193_v49  ;;  %v544_v17 = vmul.f32 %v1707_v59, %v517_v32 }
 0x121   :  { %v367_v27 = vadd.f32 %v351_v23, %v276_v9  ;;  %v581_v12 = vrot.slane %v546_v62, 1  ;;  %v352_v20 = vsel %vm122_vm0, %v1697_v7, %v1771_v28  ;;  %v2085_v7 = vld [vmem:[#allocation8_spill] sm:$0xff]  ;;  %v573_v23 = vsel %vm449_vm1, %v571_v43, %v572_v36  ;;  %v2087_v62 = vld [vmem:[#allocation5_spill] sm:$0xff]  ;;  %v2089_v43 = vld [vmem:[#allocation7_spill] sm:$0xff] }
 0x122   :  { %v233_v4 = vadd.f32 %v2080_v24, %v189_v13  ;;  %v281_v24 = vadd.f32 %v1731_v16, %v237_v38  ;;  %v357_v28 = vsel %vm122_vm0, %v1781_v2, %v2085_v7  ;;  %v586_v16 = vrot.slane %v544_v17, 1 }
 0x123   :  { %v343_v34 = vpop.permute.xlu1 %342  ;;  %v483_v21 = vadd.f32 %v2084_v42, %v367_v27  ;;  %v582_v5 = vsel %vm449_vm1, %v580_v39, %v581_v12  ;;  %v373_v30 = vadd.f32 %v357_v28, %v1739_v52  ;;  %v576_v2 = vsel %vm449_vm1, %v574_v1, %v575_v37 }
 0x124   :  { %v354_v53 = vsel %vm122_vm0, %v2079_v3, %v343_v34  ;;  %v1834_v19 = vpop.permute.xlu0 %714  ;;  %v277_v8 = vadd.f32 %v2082_v15, %v233_v4  ;;  %v355_v13 = vsel %vm122_vm0, %v343_v34, %v2083_v51  ;;  %v597_v34 = vadd.f32 %v1775_v50, %v482_v11  ;;  %v2086_v4 = vld [vmem:[#allocation9_spill] sm:$0xff] }
 0x125   :  { %v370_v29 = vadd.f32 %v354_v53, %v279_v22  ;;  %v371_v48 = vadd.f32 %v355_v13, %v280_v56  ;;  %v583_v53 = vrot.slane %v543_v55, 1  ;;  %v584_v50 = vrot.slane %v547_v63, 1 }
 0x126   :  { %v368_v59 = vadd.f32 %v352_v20, %v277_v8  ;;  %v372_v31 = vadd.f32 %v356_v18, %v281_v24  ;;  %v598_v10 = vadd.f32 %v570_v33, %v483_v21  ;;  %v588_v37 = vsel %vm449_vm1, %v586_v16, %v587_v47 }
 0x127   :  { %v486_v25 = vadd.f32 %v464_v61, %v370_v29  ;;  %v487_v0 = vadd.f32 %v2086_v4, %v371_v48  ;;  %v585_v11 = vsel %vm449_vm1, %v583_v53, %v584_v50  ;;  %v489_v36 = vadd.f32 %v2089_v43, %v373_v30 }
 0x128   :  { %v484_v9 = vadd.f32 %v2087_v62, %v368_v59  ;;  %v488_v13 = vadd.f32 %v2088_v6, %v372_v31  ;;  %v729_v33 = vsel %vm122_vm0, %v1814_v58, %v1834_v19  ;;  %v600_v39 = vadd.f32 %v576_v2, %v1799_v45 }
 0x129   :  { %v601_v22 = vadd.f32 %v579_v35, %v486_v25  ;;  %v602_v8 = vadd.f32 %v582_v5, %v487_v0  ;;  %v604_v12 = vadd.f32 %v588_v37, %v489_v36 }
 0x12a   :  { %v599_v27 = vadd.f32 %v573_v23, %v484_v9 }
 0x12b   :  { %v717_v61 = vpop.permute.xlu1 %716 }
 0x12c   :  { %v730_v46 = vsel %vm122_vm0, %v717_v61, %v719_v26  ;;  %v709_v40 = vpop.permute.xlu0 %708 }
 0x12d   :  { %v1865_v44 = vadd.f32 %v730_v46, %v601_v22  ;;  %v726_v41 = vsel %vm122_vm0, %v1722_v14, %v709_v40  ;;  %v1918_v22 = vadd.f32 %v729_v33, %v600_v39 }
 0x12e   :  { %v1873_v3 = vadd.f32 %v726_v41, %v597_v34  ;;  %v603_v34 = vadd.f32 %v585_v11, %v488_v13 }
 0x12f   :  { %v782_v14 = vmul.f32 %v1865_v44, %v1865_v44  ;;  %v781_v21 = vmul.f32 %v1918_v22, %v1918_v22 }
 0x130   :  { %v750_v29 = vadd.f32 %v1865_v44, %v1873_v3  ;;  %v778_v32 = vmul.f32 %v1873_v3, %v1873_v3 }
 0x132   :  { %v751_v49 = vrot.slane %v750_v29, 4  ;;  %v786_v25 = vadd.f32 %v782_v14, %v778_v32 }
 0x133   :  { %v711_v35 = vpop.permute.xlu1 %710 }
 0x134   :  { %v727_v15 = vsel %vm122_vm0, %v709_v40, %v711_v35  ;;  %v721_v52 = vpop.permute.xlu0 %720  ;;  %v752_v51 = vadd.f32 %v751_v49, %v750_v29  ;;  %v728_v55 = vsel %vm122_vm0, %v711_v35, %v1814_v58  ;;  %v787_v38 = vrot.slane %v786_v25, 4  ;;  %v725_v58 = vpop.permute.xlu2 %724 }
 0x135   :  { %v1899_v60 = vadd.f32 %v727_v15, %v598_v10  ;;  %v731_v1 = vsel %vm122_vm0, %v719_v26, %v721_v52  ;;  %v1920_v17 = vadd.f32 %v728_v55, %v599_v27 }
 0x136   :  { %v1907_v57 = vadd.f32 %v731_v1, %v602_v8  ;;  %v753_v56 = vrot.slane %v752_v51, 2  ;;  %v788_v20 = vadd.f32 %v787_v38, %v786_v25 }
 0x137   :  { %v779_v63 = vmul.f32 %v1899_v60, %v1899_v60  ;;  %v780_v24 = vmul.f32 %v1920_v17, %v1920_v17 }
 0x138   :  { %v757_v26 = vadd.f32 %v1907_v57, %v1899_v60  ;;  %v783_v61 = vmul.f32 %v1907_v57, %v1907_v57  ;;  %v754_v19 = vadd.f32 %v753_v56, %v752_v51  ;;  %v789_v32 = vrot.slane %v788_v20, 2 }
 0x13a   :  { %v758_v45 = vrot.slane %v757_v26, 4  ;;  %v793_v48 = vadd.f32 %v783_v61, %v779_v63  ;;  %v755_v46 = vrot.slane %v754_v19, 1  ;;  %v790_v11 = vadd.f32 %v789_v32, %v788_v20 }
 0x13b   :  { %v723_v40 = vpop.permute.xlu1 %722 }
 0x13c   :  { %v732_v41 = vsel %vm122_vm0, %v721_v52, %v723_v40  ;;  %v733_v54 = vsel %vm122_vm0, %v723_v40, %v725_v58  ;;  %v1924_v18 = vadd.f32 %v755_v46, %v754_v19  ;;  %v759_v53 = vadd.f32 %v758_v45, %v757_v26 }
 0x13d   :  { %v1926_v50 = vadd.f32 %v732_v41, %v603_v34  ;;  %v1928_v42 = vadd.f32 %v733_v54, %v604_v12  ;;  %v794_v28 = vrot.slane %v793_v48, 4  ;;  %v791_v1 = vrot.slane %v790_v11, 1 }
 0x13e   :  { %814 = vrot.lane.b32.xlu0 %v1924_v18, %s1031_s19  ;;  %v760_v7 = vrot.slane %v759_v53, 2  ;;  %v822_v46 = vlaneseq }
 0x13f   :  { %v764_v14 = vadd.f32 %v1926_v50, %v1920_v17  ;;  %v771_v59 = vadd.f32 %v1928_v42, %v1918_v22  ;;  %v784_v4 = vmul.f32 %v1926_v50, %v1926_v50  ;;  %v785_v0 = vmul.f32 %v1928_v42, %v1928_v42 }
 0x140   :  { %v761_v29 = vadd.f32 %v760_v7, %v759_v53  ;;  %v795_v2 = vadd.f32 %v794_v28, %v793_v48  ;;  %v792_v63 = vadd.f32 %v791_v1, %v790_v11  ;;  %v823_v40 = vand.u32 127, %v822_v46 }
 0x141   :  { %v765_v31 = vrot.slane %v764_v14, 4  ;;  %v772_v5 = vrot.slane %v771_v59, 4  ;;  %v800_v16 = vadd.f32 %v784_v4, %v780_v24  ;;  %v807_v47 = vadd.f32 %v785_v0, %v781_v21 }
 0x142   :  { %v762_v30 = vrot.slane %v761_v29, 1  ;;  %v796_v6 = vrot.slane %v795_v2, 2  ;;  %vm824_vm2 = vcmp.lt.s32.totalorder %v823_v40, 64 }
 0x143   :  { %v766_v49 = vadd.f32 %v765_v31, %v764_v14  ;;  %v773_v25 = vadd.f32 %v772_v5, %v771_v59  ;;  %v808_v23 = vrot.slane %v807_v47, 4  ;;  %v801_v35 = vrot.slane %v800_v16, 4 }
 0x144   :  { %v763_v10 = vadd.f32 %v762_v30, %v761_v29  ;;  %v797_v39 = vadd.f32 %v796_v6, %v795_v2 }
 0x145   :  { %v767_v62 = vrot.slane %v766_v49, 2  ;;  %v774_v9 = vrot.slane %v773_v25, 2  ;;  %v809_v15 = vadd.f32 %v808_v23, %v807_v47  ;;  %v802_v8 = vadd.f32 %v801_v35, %v800_v16 }
 0x146   :  { %816 = vrot.lane.b32.xlu1 %v763_v10, %s1031_s19  ;;  %v798_v27 = vrot.slane %v797_v39, 1 }
 0x147   :  { %v768_v52 = vadd.f32 %v767_v62, %v766_v49  ;;  %v775_v51 = vadd.f32 %v774_v9, %v773_v25  ;;  %v803_v13 = vrot.slane %v802_v8, 2  ;;  %v810_v37 = vrot.slane %v809_v15, 2 }
 0x148   :  { %v799_v19 = vadd.f32 %v798_v27, %v797_v39 }
 0x149   :  { %v769_v43 = vrot.slane %v768_v52, 1  ;;  %v776_v36 = vrot.slane %v775_v51, 1  ;;  %v804_v55 = vadd.f32 %v803_v13, %v802_v8  ;;  %v811_v38 = vadd.f32 %v810_v37, %v809_v15 }
 0x14b   :  { %v770_v33 = vadd.f32 %v769_v43, %v768_v52  ;;  %v777_v56 = vadd.f32 %v776_v36, %v775_v51  ;;  %v805_v26 = vrot.slane %v804_v55, 1  ;;  %v812_v61 = vrot.slane %v811_v38, 1 }
 0x14d   :  { %818 = vrot.lane.b32.xlu2 %v770_v33, %s1031_s19  ;;  %820 = vrot.lane.b32.xlu0 %v777_v56, %s1031_s19  ;;  %v806_v45 = vadd.f32 %v805_v26, %v804_v55  ;;  %v813_v48 = vadd.f32 %v812_v61, %v811_v38 }
 0x14e   :  { %833 = vrot.lane.b32.xlu1 %v792_v63, %s1031_s19 }
 0x155   :  { %835 = vrot.lane.b32.xlu2 %v799_v19, %s1031_s19  ;;  %837 = vrot.lane.b32.xlu0 %v806_v45, %s1031_s19 }
 0x156   :  { %839 = vrot.lane.b32.xlu1 %v813_v48, %s1031_s19 }
 0x1a7   :  { %v819_v12 = vpop.permute.xlu2 %818 }
 0x1af   :  { %v836_v31 = vpop.permute.xlu2 %835 }
 0x1b0   :  { %v815_v58 = vpop.permute.xlu0 %814 }
 0x1b8   :  { %v817_v34 = vpop.permute.xlu1 %816 }
 0x1b9   :  { %v826_v20 = vsel %vm824_vm2, %v817_v34, %v819_v12  ;;  %v827_v41 = vsel %vm824_vm2, %v815_v58, %v817_v34 }
 0x1ba   :  { %v830_v7 = vadd.f32 %v827_v41, %v763_v10  ;;  %v831_v28 = vadd.f32 %v826_v20, %v770_v33 }
 0x1bc   :  { %v851_v32 = vadd.f32 %v831_v28, %v830_v7 }
 0x1bf   :  { %v821_v54 = vpop.permute.xlu0 %820 }
 0x1c0   :  { %v834_v53 = vpop.permute.xlu1 %833  ;;  %v825_v21 = vsel %vm824_vm2, %v819_v12, %v821_v54  ;;  %v828_v24 = vsel %vm824_vm2, %v821_v54, %v815_v58 }
 0x1c1   :  { %v829_v14 = vadd.f32 %v828_v24, %v1924_v18  ;;  %v832_v59 = vadd.f32 %v825_v21, %v777_v56  ;;  %v843_v5 = vsel %vm824_vm2, %v834_v53, %v836_v31  ;;  %v891_v21 = vld [vmem:[%s2006_s2] sm:$0xf] }
 0x1c2   :  { %v846_v35 = vadd.f32 %v843_v5, %v799_v19 }
 0x1c3   :  { %v849_v4 = vadd.f32 %v832_v59, %v829_v14  ;;  %v850_v0 = vadd.f32 %v830_v7, %v829_v14  ;;  %v852_v29 = vadd.f32 %v832_v59, %v831_v28 }
 0x1c5   :  { %v857_v16 = vadd.f32 %v851_v32, %v849_v4  ;;  %v858_v47 = vadd.f32 %v852_v29, %v850_v0 }
 0x1c7   :  { %v838_v30 = vpop.permute.xlu0 %837  ;;  %v861_v62 = vmul.f32 0.0078125, %v857_v16  ;;  %v862_v9 = vmul.f32 0.0078125, %v858_v47 }
 0x1c8   :  { %v840_v2 = vpop.permute.xlu1 %839  ;;  %v842_v49 = vsel %vm824_vm2, %v836_v31, %v838_v30 }
 0x1c9   :  { %v844_v25 = vsel %vm824_vm2, %v840_v2, %v834_v53  ;;  %v841_v23 = vsel %vm824_vm2, %v838_v30, %v840_v2  ;;  %v847_v10 = vadd.f32 %v842_v49, %v806_v45  ;;  %v865_v1 = vmul.f32 %v861_v62, %v861_v62  ;;  %v905_v49 = vld [vmem:[%s2007_s3] sm:$0xf] }
 0x1ca   :  { %v845_v18 = vadd.f32 %v844_v25, %v792_v63  ;;  %v848_v11 = vadd.f32 %v841_v23, %v813_v48  ;;  %v866_v37 = vmul.f32 %v862_v9, %v862_v9 }
 0x1cb   :  { %v855_v52 = vadd.f32 %v847_v10, %v846_v35 }
 0x1cc   :  { %v854_v15 = vadd.f32 %v846_v35, %v845_v18  ;;  %v853_v8 = vadd.f32 %v848_v11, %v845_v18  ;;  %v856_v51 = vadd.f32 %v848_v11, %v847_v10 }
 0x1ce   :  { %v859_v6 = vadd.f32 %v855_v52, %v853_v8  ;;  %v860_v13 = vadd.f32 %v856_v51, %v854_v15 }
 0x1d0   :  { %v863_v43 = vmul.f32 0.0078125, %v859_v6  ;;  %v864_v36 = vmul.f32 0.0078125, %v860_v13 }
 0x1d2   :  { %v867_v33 = vsub.f32 %v863_v43, %v865_v1  ;;  %v868_v56 = vsub.f32 %v864_v36, %v866_v37 }
 0x1d4   :  { %v869_v39 = vadd.f32 0.001, %v867_v33  ;;  %v870_v55 = vadd.f32 0.001, %v868_v56 }
 0x1d6   :  { %1027 = vrsqrt.f32 %v869_v39  ;;  %vm877_vm5 = vweird.f32 %v869_v39  ;;  %vm887_vm7 = vweird.f32 %v870_v55 }
 0x1d7   :  { %1029 = vrsqrt.f32 %v870_v55 }
 0x1dc   :  { %v1028_v63 = vpop.eup %1027 }
 0x1dd   :  { %v1030_v38 = vpop.eup %1029  ;;  %v872_v27 = vmul.f32 %v1028_v63, %v869_v39  ;;  %vm878_vm3 = vweird.f32 %v1028_v63 }
 0x1de   :  { %v882_v26 = vmul.f32 %v1030_v38, %v870_v55  ;;  %vm888_vm4 = vweird.f32 %v1030_v38  ;;  %vm879_vm6 = vmor %vm877_vm5, %vm878_vm3 }
 0x1df   :  { %v873_v61 = vmul.f32 %v1028_v63, %v872_v27  ;;  %vm889_vm8 = vmor %vm887_vm7, %vm888_vm4 }
 0x1e0   :  { %v883_v19 = vmul.f32 %v1030_v38, %v882_v26 }
 0x1e1   :  { %v874_v45 = vmul.f32 0.5, %v873_v61 }
 0x1e2   :  { %v884_v48 = vmul.f32 0.5, %v883_v19 }
 0x1e3   :  { %v875_v46 = vsub.f32 1.5, %v874_v45 }
 0x1e4   :  { %v885_v58 = vsub.f32 1.5, %v884_v48 }
 0x1e5   :  { %v876_v40 = vmul.f32 %v1028_v63, %v875_v46 }
 0x1e6   :  { %v886_v34 = vmul.f32 %v1030_v38, %v885_v58 }
 0x1e7   :  { %v880_v12 = vsel %vm879_vm6, %v1028_v63, %v876_v40 }
 0x1e8   :  { %v890_v20 = vsel %vm889_vm8, %v1030_v38, %v886_v34  ;;  %v895_v41 = vrot.slane %v880_v12, 6 }
 0x1e9   :  { %v894_v54 = vrot.slane %v890_v20, 7  ;;  %v896_v53 = vrot.slane %v890_v20, 5 }
 0x1eb   :  { %v898_v24 = vsel %vm897_vm9, %v880_v12, %v894_v54  ;;  %v900_v7 = vsel %vm899_vm10, %v895_v41, %v896_v53 }
 0x1ec   :  { %v902_v28 = vsel %vm901_vm11, %v898_v24, %v900_v7 }
 0x1ed   :  { %v904_v14 = vmul.f32 %v902_v28, %v891_v21 }
 0x1ef   :  { %v907_v59 = vperm.slane %v904_v14, 0  ;;  %v908_v4 = vperm.slane %v904_v14, 1  ;;  %v909_v0 = vperm.slane %v904_v14, 2  ;;  %v910_v29 = vperm.slane %v904_v14, 3 }
 0x1f1   :  { %v916_v32 = vmul.f32 %v908_v4, %v862_v9  ;;  %v917_v31 = vmul.f32 %v909_v0, %v861_v62  ;;  %v918_v5 = vmul.f32 %v910_v29, %v862_v9  ;;  %v915_v16 = vmul.f32 %v907_v59, %v861_v62 }
 0x1f2   :  { %v931_v10 = vmul.f32 %v907_v59, %v1873_v3  ;;  %v932_v11 = vmul.f32 %v908_v4, %v1899_v60  ;;  %v933_v62 = vmul.f32 %v909_v0, %v1920_v17  ;;  %v934_v9 = vmul.f32 %v910_v29, %v1918_v22 }
 0x1f3   :  { %v923_v47 = vrot.slane %v916_v32, 7  ;;  %v924_v30 = vrot.slane %v917_v31, 6  ;;  %v925_v2 = vrot.slane %v918_v5, 5  ;;  %v935_v6 = vmul.f32 %v907_v59, %v1865_v44 }
 0x1f4   :  { %v936_v13 = vmul.f32 %v908_v4, %v1907_v57  ;;  %v937_v1 = vmul.f32 %v909_v0, %v1926_v50  ;;  %v938_v60 = vmul.f32 %v910_v29, %v1928_v42 }
 0x1f5   :  { %v926_v25 = vsel %vm897_vm9, %v915_v16, %v923_v47  ;;  %v927_v23 = vsel %vm899_vm10, %v924_v30, %v925_v2 }
 0x1f6   :  { %v928_v35 = vsel %vm901_vm11, %v926_v25, %v927_v23 }
 0x1f7   :  { %v930_v18 = vsub.f32 %v905_v49, %v928_v35 }
 0x1f9   :  { %v940_v15 = vperm.slane %v930_v18, 0  ;;  %v941_v8 = vperm.slane %v930_v18, 1  ;;  %v942_v52 = vperm.slane %v930_v18, 2  ;;  %v943_v51 = vperm.slane %v930_v18, 3 }
 0x1fb   :  { %v948_v37 = vadd.f32 %v940_v15, %v931_v10  ;;  %v949_v43 = vadd.f32 %v941_v8, %v932_v11  ;;  %v950_v36 = vadd.f32 %v942_v52, %v933_v62  ;;  %v951_v3 = vadd.f32 %v943_v51, %v934_v9 }
 0x1fc   :  { %v952_v33 = vadd.f32 %v940_v15, %v935_v6  ;;  %v953_v17 = vadd.f32 %v941_v8, %v936_v13  ;;  %v954_v56 = vadd.f32 %v942_v52, %v937_v1  ;;  %v955_v63 = vadd.f32 %v943_v51, %v938_v60 }
 0x1fd   :  { %v956_v22 = vmax.f32 %v948_v37, 0.0  ;;  %v957_v39 = vmax.f32 %v949_v43, 0.0  ;;  %v958_v55 = vmax.f32 %v950_v36, 0.0  ;;  %v959_v38 = vmax.f32 %v951_v3, 0.0 }
 0x1fe   :  { %v960_v27 = vmax.f32 %v952_v33, 0.0  ;;  %v961_v44 = vmax.f32 %v953_v17, 0.0  ;;  %v962_v57 = vmax.f32 %v954_v56, 0.0  ;;  %v963_v50 = vmax.f32 %v955_v63, 0.0 }
 0x1ff   :  { %964 = vst [vmem:[%s2008_s4] sm:$0xff] %v956_v22 }
 0x200   :  { %965 = vst [vmem:[%s2008_s4 + $0x8] sm:$0xff] %v957_v39 }
 0x201   :  { %966 = vst [vmem:[%s2008_s4 + $0x10] sm:$0xff] %v958_v55 }
 0x202   :  { %967 = vst [vmem:[%s2008_s4 + $0x18] sm:$0xff] %v959_v38 }
 0x203   :  { %968 = vst [vmem:[%s2008_s4 + $0x20] sm:$0xff] %v960_v27 }
 0x204   :  { %969 = vst [vmem:[%s2008_s4 + $0x28] sm:$0xff] %v961_v44 }
 0x205   :  { %970 = vst [vmem:[%s2008_s4 + $0x30] sm:$0xff] %v962_v57 }
 0x206   :  { %971 = vst [vmem:[%s2008_s4 + $0x38] sm:$0xff] %v963_v50 }

</bundles_post_ra>
